<compile_context>
chip_gen: v6e
topology: v6e:2x2x1
jax: 0.10.0
libtpu: 0.0.40
codegen_flags: <defaults>
</compile_context>

<pallas_src>
import functools

import jax
import jax.numpy as jnp
from jax import lax
from jax.experimental import pallas as pl
from jax.experimental.pallas import tpu as pltpu

LANE = 128


def _conv_bn_relu_kernel(x_ref, w_ref, sb_ref, o_ref, col_ref, *,
                         KH, KW, Wo, TH):
    # x_ref  : (1, Hp, Wp, C)    whole padded input image (compute dtype),
    #                            resident across the H-tile grid axis
    # w_ref  : (K, OCp)          im2col weights, K = KH*KW*C, OCp % 128 == 0
    # sb_ref : (2, OCp)          f32; row 0 = scale, row 1 = shift
    # o_ref  : (1, TH*Wo, OCp)   lane-dense f32 output strip
    # col_ref: (TH*Wo, K)        im2col scratch (compute dtype)
    C = x_ref.shape[-1]
    h = pl.program_id(1)
    row0 = pl.multiple_of(h * TH, TH)      # first padded-input row of strip

    # Build the im2col slab once:
    #   col[p, (kh*KW + kw)*C + c] = x_pad[row0 + kh + p // Wo, kw + p % Wo, c]
    n_rows = TH + KH - 1                   # output rows + halo
    for kw in range(KW):
        # One flattening reshape per kw (W-shifted image, rows flattened).
        flat = x_ref[0, pl.ds(row0, n_rows), kw:kw + Wo, :].reshape(
            n_rows * Wo, C)
        for kh in range(KH):
            tap = kh * KW + kw
            # Contiguous, sublane-aligned row slice of the flattened image.
            col_ref[:, tap * C:(tap + 1) * C] = (
                flat[kh * Wo:kh * Wo + TH * Wo, :])

    # Single folded matmul on the MXU (contraction depth K = KH*KW*C).
    acc = jnp.dot(col_ref[...], w_ref[...], preferred_element_type=jnp.float32)

    # f32 epilogue: folded conv-bias + eval-mode BatchNorm affine, then ReLU.
    scale = sb_ref[0:1, :]
    shift = sb_ref[1:2, :]
    o_ref[0] = jnp.maximum(acc * scale + shift, 0.0).astype(o_ref.dtype)


def conv_bn_relu(x_nchw, weight, conv_bias, gamma, beta,
                 running_mean, running_var, eps=1e-5, padding=1,
                 compute_dtype=jnp.bfloat16, block_h=8):
    """Conv2d(kxk, padding) -> BatchNorm2d(eval) -> ReLU.  NCHW in / NCHW out."""
    N, C, H, W = x_nchw.shape
    OC, Cw, KH, KW = weight.shape
    assert Cw == C, (Cw, C)

    Hp, Wp = H + 2 * padding, W + 2 * padding
    Ho, Wo = Hp - KH + 1, Wp - KW + 1          # output spatial size
    K = KH * KW * C
    OCp = ((OC + LANE - 1) // LANE) * LANE     # lane-dense output channels

    # Output row-tile; second-to-last out-block dim must be a multiple of 8
    # unless it spans the whole axis.
    TH = block_h
    if Ho % TH != 0 or (TH * Wo) % 8 != 0:
        TH = Ho

    # ---- wrapper-side glue (plain JAX) ------------------------------------
    x = jnp.transpose(x_nchw, (0, 2, 3, 1))                    # NCHW -> NHWC
    x = jnp.pad(x, ((0, 0), (padding, padding), (padding, padding), (0, 0)))
    x = x.astype(compute_dtype)

    # (OC, C, KH, KW) -> im2col layout (KH*KW*C, OCp), zero-padded channels.
    w2d = jnp.transpose(weight, (2, 3, 1, 0)).reshape(K, OC)
    w2d = jnp.pad(w2d, ((0, 0), (0, OCp - OC))).astype(compute_dtype)

    # Fold conv bias + eval-mode BatchNorm into per-channel affine (f32).
    scale = gamma / jnp.sqrt(running_var + eps)
    shift = beta + scale * (conv_bias - running_mean)
    sb = jnp.stack([scale, shift], axis=0)
    sb = jnp.pad(sb, ((0, 0), (0, OCp - OC))).astype(jnp.float32)

    kernel = functools.partial(_conv_bn_relu_kernel,
                               KH=KH, KW=KW, Wo=Wo, TH=TH)

    out = pl.pallas_call(
        kernel,
        out_shape=jax.ShapeDtypeStruct((N, Ho * Wo, OCp), x_nchw.dtype),
        grid_spec=pltpu.PrefetchScalarGridSpec(
            num_scalar_prefetch=0,
            grid=(N, Ho // TH),
            in_specs=[
                # Whole padded image; block index constant along the H-tile
                # axis -> DMA'd once per batch element, reused across strips.
                pl.BlockSpec((1, Hp, Wp, C), lambda n, h: (n, 0, 0, 0)),
                pl.BlockSpec((K, OCp), lambda n, h: (0, 0)),
                pl.BlockSpec((2, OCp), lambda n, h: (0, 0)),
            ],
            out_specs=pl.BlockSpec((1, TH * Wo, OCp), lambda n, h: (n, h, 0)),
            scratch_shapes=[pltpu.VMEM((TH * Wo, K), compute_dtype)],
        ),
        compiler_params=pltpu.CompilerParams(
            dimension_semantics=("parallel", "parallel"),
            vmem_limit_bytes=32 * 1024 * 1024,
        ),
    )(x, w2d, sb)

    # (N, Ho*Wo, OCp) -> (N, OC, Ho, Wo); drop the zero-padded channels.
    out = out.reshape(N, Ho, Wo, OCp)[..., :OC]
    return jnp.transpose(out, (0, 3, 1, 2))


def conv_bn_relu_reference(x, weight, conv_bias, gamma, beta, mean, var,
                           eps=1e-5, padding=1):
    y = lax.conv_general_dilated(
        x, weight, window_strides=(1, 1),
        padding=[(padding, padding), (padding, padding)],
        dimension_numbers=("NCHW", "OIHW", "NCHW"))
    y = y + conv_bias[None, :, None, None]
    y = (y - mean[None, :, None, None]) * lax.rsqrt(
        var[None, :, None, None] + eps)
    y = gamma[None, :, None, None] * y + beta[None, :, None, None]
    return jnp.maximum(y, 0.0)


if __name__ == "__main__":
    key = jax.random.PRNGKey(0)
    kx, kw, kb, kg, kbt, km, kv = jax.random.split(key, 7)

    N, C, H, W = 2, 4, 16, 16
    OC, KH, KW = 8, 3, 3

    x = jax.random.normal(kx, (N, C, H, W), dtype=jnp.float32)
    weight = 0.1 * jax.random.normal(kw, (OC, C, KH, KW), dtype=jnp.float32)
    conv_bias = 0.1 * jax.random.normal(kb, (OC,), dtype=jnp.float32)
    gamma = 1.0 + 0.1 * jax.random.normal(kg, (OC,), dtype=jnp.float32)
    beta = 0.1 * jax.random.normal(kbt, (OC,), dtype=jnp.float32)
    running_mean = 0.1 * jax.random.normal(km, (OC,), dtype=jnp.float32)
    running_var = jax.random.uniform(kv, (OC,), dtype=jnp.float32,
                                     minval=0.5, maxval=1.5)

    out = conv_bn_relu(x, weight, conv_bias, gamma, beta,
                       running_mean, running_var)
    out = jax.block_until_ready(out)

    ref = conv_bn_relu_reference(x, weight, conv_bias, gamma, beta,
                                 running_mean, running_var)
    ref = jax.block_until_ready(ref)

    assert out.shape == (N, OC, H, W), out.shape
    # bf16 matmul operands with f32 accumulation -> loose-but-tight-enough tol.
    assert jnp.allclose(out, ref, atol=2e-2, rtol=2e-2), (
        float(jnp.max(jnp.abs(out - ref))))
    print("KERNEL_OK")
</pallas_src>

<mosaic_0001>
module attributes {stable_mosaic.version = 11 : i64} {
  func.func @_conv_bn_relu_kernel(%arg0: i32, %arg1: i32, %arg2: memref<1x18x18x4xbf16, #tpu.memory_space<vmem>>, %arg3: memref<36x128xbf16, #tpu.memory_space<vmem>>, %arg4: memref<2x128xf32, #tpu.memory_space<vmem>>, %arg5: memref<1x128x128xf32, #tpu.memory_space<vmem>>, %arg6: memref<128x36xbf16, #tpu.memory_space<vmem>>) attributes {dimension_semantics = [#tpu.dimension_semantics<parallel>, #tpu.dimension_semantics<parallel>], iteration_bounds = array<i64: 2, 2>, scalar_prefetch = 0 : i64, scratch_operands = 1 : i64, tpu.core_type = #tpu.core_type<tc>, window_params = [{transform_indices = @transform_0, window_bounds = array<i64: 1, 18, 18, 4>}, {pipeline_mode = #tpu.pipeline_mode<synchronous>, transform_indices = @transform_1, window_bounds = array<i64: 36, 128>}, {pipeline_mode = #tpu.pipeline_mode<synchronous>, transform_indices = @transform_2, window_bounds = array<i64: 2, 128>}, {transform_indices = @transform_3, window_bounds = array<i64: 1, 128, 128>}]} {
    %c8_i32 = arith.constant 8 : i32
    %0 = arith.muli %arg1, %c8_i32 : i32
    %1 = tpu.assume_multiple %0, 8 : i32
    %c0 = arith.constant 0 : index
    %2 = arith.index_cast %1 : i32 to index
    %c0_0 = arith.constant 0 : index
    %c0_1 = arith.constant 0 : index
    %3 = vector.load %arg2[%c0, %2, %c0_0, %c0_1] : memref<1x18x18x4xbf16, #tpu.memory_space<vmem>>, vector<1x10x16x4xbf16>
    %4 = vector.shape_cast %3 : vector<1x10x16x4xbf16> to vector<10x16x4xbf16>
    %5 = vector.shape_cast %4 : vector<10x16x4xbf16> to vector<160x4xbf16>
    %6 = vector.extract_strided_slice %5 {offsets = [0, 0], sizes = [128, 4], strides = [1, 1]} : vector<160x4xbf16> to vector<128x4xbf16>
    %c0_2 = arith.constant 0 : index
    %c0_3 = arith.constant 0 : index
    %7 = vector.load %arg6[%c0_2, %c0_3] : memref<128x36xbf16, #tpu.memory_space<vmem>>, vector<128x4xbf16>
    tpu.vector_store %arg6[%c0_2, %c0_3], %6 {strides = array<i32>} : memref<128x36xbf16, #tpu.memory_space<vmem>>, vector<128x4xbf16>,
    %8 = vector.extract_strided_slice %5 {offsets = [16, 0], sizes = [128, 4], strides = [1, 1]} : vector<160x4xbf16> to vector<128x4xbf16>
    %c0_4 = arith.constant 0 : index
    %c12 = arith.constant 12 : index
    %9 = vector.load %arg6[%c0_4, %c12] : memref<128x36xbf16, #tpu.memory_space<vmem>>, vector<128x4xbf16>
    tpu.vector_store %arg6[%c0_4, %c12], %8 {strides = array<i32>} : memref<128x36xbf16, #tpu.memory_space<vmem>>, vector<128x4xbf16>,
    %10 = vector.extract_strided_slice %5 {offsets = [32, 0], sizes = [128, 4], strides = [1, 1]} : vector<160x4xbf16> to vector<128x4xbf16>
    %c0_5 = arith.constant 0 : index
    %c24 = arith.constant 24 : index
    %11 = vector.load %arg6[%c0_5, %c24] : memref<128x36xbf16, #tpu.memory_space<vmem>>, vector<128x4xbf16>
    tpu.vector_store %arg6[%c0_5, %c24], %10 {strides = array<i32>} : memref<128x36xbf16, #tpu.memory_space<vmem>>, vector<128x4xbf16>,
    %c0_6 = arith.constant 0 : index
    %12 = arith.index_cast %1 : i32 to index
    %c1 = arith.constant 1 : index
    %c0_7 = arith.constant 0 : index
    %13 = vector.load %arg2[%c0_6, %12, %c1, %c0_7] : memref<1x18x18x4xbf16, #tpu.memory_space<vmem>>, vector<1x10x16x4xbf16>
    %14 = vector.shape_cast %13 : vector<1x10x16x4xbf16> to vector<10x16x4xbf16>
    %15 = vector.shape_cast %14 : vector<10x16x4xbf16> to vector<160x4xbf16>
    %16 = vector.extract_strided_slice %15 {offsets = [0, 0], sizes = [128, 4], strides = [1, 1]} : vector<160x4xbf16> to vector<128x4xbf16>
    %c0_8 = arith.constant 0 : index
    %c4 = arith.constant 4 : index
    %17 = vector.load %arg6[%c0_8, %c4] : memref<128x36xbf16, #tpu.memory_space<vmem>>, vector<128x4xbf16>
    tpu.vector_store %arg6[%c0_8, %c4], %16 {strides = array<i32>} : memref<128x36xbf16, #tpu.memory_space<vmem>>, vector<128x4xbf16>,
    %18 = vector.extract_strided_slice %15 {offsets = [16, 0], sizes = [128, 4], strides = [1, 1]} : vector<160x4xbf16> to vector<128x4xbf16>
    %c0_9 = arith.constant 0 : index
    %c16 = arith.constant 16 : index
    %19 = vector.load %arg6[%c0_9, %c16] : memref<128x36xbf16, #tpu.memory_space<vmem>>, vector<128x4xbf16>
    tpu.vector_store %arg6[%c0_9, %c16], %18 {strides = array<i32>} : memref<128x36xbf16, #tpu.memory_space<vmem>>, vector<128x4xbf16>,
    %20 = vector.extract_strided_slice %15 {offsets = [32, 0], sizes = [128, 4], strides = [1, 1]} : vector<160x4xbf16> to vector<128x4xbf16>
    %c0_10 = arith.constant 0 : index
    %c28 = arith.constant 28 : index
    %21 = vector.load %arg6[%c0_10, %c28] : memref<128x36xbf16, #tpu.memory_space<vmem>>, vector<128x4xbf16>
    tpu.vector_store %arg6[%c0_10, %c28], %20 {strides = array<i32>} : memref<128x36xbf16, #tpu.memory_space<vmem>>, vector<128x4xbf16>,
    %c0_11 = arith.constant 0 : index
    %22 = arith.index_cast %1 : i32 to index
    %c2 = arith.constant 2 : index
    %c0_12 = arith.constant 0 : index
    %23 = vector.load %arg2[%c0_11, %22, %c2, %c0_12] : memref<1x18x18x4xbf16, #tpu.memory_space<vmem>>, vector<1x10x16x4xbf16>
    %24 = vector.shape_cast %23 : vector<1x10x16x4xbf16> to vector<10x16x4xbf16>
    %25 = vector.shape_cast %24 : vector<10x16x4xbf16> to vector<160x4xbf16>
    %26 = vector.extract_strided_slice %25 {offsets = [0, 0], sizes = [128, 4], strides = [1, 1]} : vector<160x4xbf16> to vector<128x4xbf16>
    %c0_13 = arith.constant 0 : index
    %c8 = arith.constant 8 : index
    %27 = vector.load %arg6[%c0_13, %c8] : memref<128x36xbf16, #tpu.memory_space<vmem>>, vector<128x4xbf16>
    tpu.vector_store %arg6[%c0_13, %c8], %26 {strides = array<i32>} : memref<128x36xbf16, #tpu.memory_space<vmem>>, vector<128x4xbf16>,
    %28 = vector.extract_strided_slice %25 {offsets = [16, 0], sizes = [128, 4], strides = [1, 1]} : vector<160x4xbf16> to vector<128x4xbf16>
    %c0_14 = arith.constant 0 : index
    %c20 = arith.constant 20 : index
    %29 = vector.load %arg6[%c0_14, %c20] : memref<128x36xbf16, #tpu.memory_space<vmem>>, vector<128x4xbf16>
    tpu.vector_store %arg6[%c0_14, %c20], %28 {strides = array<i32>} : memref<128x36xbf16, #tpu.memory_space<vmem>>, vector<128x4xbf16>,
    %30 = vector.extract_strided_slice %25 {offsets = [32, 0], sizes = [128, 4], strides = [1, 1]} : vector<160x4xbf16> to vector<128x4xbf16>
    %c0_15 = arith.constant 0 : index
    %c32 = arith.constant 32 : index
    %31 = vector.load %arg6[%c0_15, %c32] : memref<128x36xbf16, #tpu.memory_space<vmem>>, vector<128x4xbf16>
    tpu.vector_store %arg6[%c0_15, %c32], %30 {strides = array<i32>} : memref<128x36xbf16, #tpu.memory_space<vmem>>, vector<128x4xbf16>,
    %c0_16 = arith.constant 0 : index
    %c0_17 = arith.constant 0 : index
    %32 = vector.load %arg6[%c0_16, %c0_17] : memref<128x36xbf16, #tpu.memory_space<vmem>>, vector<128x36xbf16>
    %c0_18 = arith.constant 0 : index
    %c0_19 = arith.constant 0 : index
    %33 = vector.load %arg3[%c0_18, %c0_19] : memref<36x128xbf16, #tpu.memory_space<vmem>>, vector<36x128xbf16>
    %cst = arith.constant dense<0.000000e+00> : vector<128x128xf32>
    %34 = tpu.matmul %32, %33, %cst {dimension_numbers = #tpu.dot_dimension_numbers<[1], [0], [0], [1], [0, 0, 1, 1], [], []>} : vector<128x36xbf16>, vector<36x128xbf16>, vector<128x128xf32> -> vector<128x128xf32>
    %c0_20 = arith.constant 0 : index
    %c0_21 = arith.constant 0 : index
    %35 = vector.load %arg4[%c0_20, %c0_21] : memref<2x128xf32, #tpu.memory_space<vmem>>, vector<1x128xf32>
    %c1_22 = arith.constant 1 : index
    %c0_23 = arith.constant 0 : index
    %36 = vector.load %arg4[%c1_22, %c0_23] : memref<2x128xf32, #tpu.memory_space<vmem>>, vector<1x128xf32>
    %37 = vector.broadcast %35 : vector<1x128xf32> to vector<128x128xf32>
    %38 = arith.mulf %34, %37 : vector<128x128xf32>
    %39 = vector.broadcast %36 : vector<1x128xf32> to vector<128x128xf32>
    %40 = arith.addf %38, %39 : vector<128x128xf32>
    %cst_24 = arith.constant 0.000000e+00 : f32
    %41 = vector.broadcast %cst_24 : f32 to vector<128x128xf32>
    %42 = arith.maximumf %40, %41 : vector<128x128xf32>
    %c0_25 = arith.constant 0 : index
    %c0_26 = arith.constant 0 : index
    %c0_27 = arith.constant 0 : index
    %43 = vector.load %arg5[%c0_25, %c0_26, %c0_27] : memref<1x128x128xf32, #tpu.memory_space<vmem>>, vector<1x128x128xf32>
    %44 = vector.shape_cast %43 : vector<1x128x128xf32> to vector<128x128xf32>
    %45 = vector.shape_cast %42 : vector<128x128xf32> to vector<1x128x128xf32>
    tpu.vector_store %arg5[%c0_25, %c0_26, %c0_27], %45 {strides = array<i32>} : memref<1x128x128xf32, #tpu.memory_space<vmem>>, vector<1x128x128xf32>,
    return
  }
  func.func @transform_0(%arg0: i32, %arg1: i32) -> (i32, i32, i32, i32) {
    %c0_i32 = arith.constant 0 : i32
    %c0_i32_0 = arith.constant 0 : i32
    %c0_i32_1 = arith.constant 0 : i32
    %c0_i32_2 = arith.constant 0 : i32
    return %arg0, %c0_i32, %c0_i32_0, %c0_i32_1 : i32, i32, i32, i32
  }
  func.func @transform_1(%arg0: i32, %arg1: i32) -> (i32, i32) {
    %c0_i32 = arith.constant 0 : i32
    %c0_i32_0 = arith.constant 0 : i32
    %c0_i32_1 = arith.constant 0 : i32
    return %c0_i32, %c0_i32_0 : i32, i32
  }
  func.func @transform_2(%arg0: i32, %arg1: i32) -> (i32, i32) {
    %c0_i32 = arith.constant 0 : i32
    %c0_i32_0 = arith.constant 0 : i32
    %c0_i32_1 = arith.constant 0 : i32
    return %c0_i32, %c0_i32_0 : i32, i32
  }
  func.func @transform_3(%arg0: i32, %arg1: i32) -> (i32, i32, i32) {
    %c0_i32 = arith.constant 0 : i32
    %c0_i32_0 = arith.constant 0 : i32
    return %arg0, %arg1, %c0_i32 : i32, i32, i32
  }
}

</mosaic_0001>

<bundles_post_ra>
// kernel: tpu_custom_call.1
= control target key start
LH: loop header
LB: loop body
LE: loop exit
PB: predicated region body
PF: predicated region fallthrough
CT: control target
= control target key end

     0   :  { %8 = vsyncpa [#allocation4], 0  ;;  %s2673_s0 = inlined_call_operand.vmem [shape: bf16[2,18,18,4], index: 0, kind: input, shape index: {}]   ;;  %s2674_s1 = inlined_call_operand.vmem [shape: bf16[36,128], index: 1, kind: input, shape index: {}]   ;;  %s2675_s2 = inlined_call_operand.vmem [shape: f32[2,128], index: 2, kind: input, shape index: {}]   ;;  %s2676_s3 = inlined_call_operand.hbm [shape: f32[2,256,128], index: 3, kind: output, shape index: {}]  }
   0x1   :  { %10 = vsyncpa [#allocation4 + $0x1], 0  ;;  %s1845_s12 = smov 0   ;;  %s1847_s13 = smov 0  }
   0x2   :  { %s1849_s14 = smov 0   ;;  %s1851_s15 = smov 0  }
   0x3   :  { %s1853_s16 = smov 0   ;;  %s1855_s17 = smov 0  }
   0x4   :  { %s1857_s18 = smov 0   ;;  %s1859_s19 = smov 0  }
   0x5 LB: > { %s1540_s20 = sadd.s32 4294967295, %s1813_s19   ;;  %s1541_s21 = sadd.s32 4294967294, %s1813_s19   ;;  %s1813_s19 = sphi %s1859_s19, %s16_s19   ;;  %s1809_s18 = sphi %s1857_s18, %s2689_s18   ;;  %s1805_s17 = sphi %s1855_s17, %s2688_s17   ;;  %s1801_s16 = sphi %s1853_s16, %s2687_s16   ;;  %s1797_s15 = sphi %s1851_s15, %s2686_s15   ;;  %s1793_s14 = sphi %s1849_s14, %s2685_s14   ;;  %s1789_s13 = sphi %s1847_s13, %s2684_s13   ;;  %s1785_s12 = sphi %s1845_s12, %s2683_s12  }
   0x6   : > { %s25_s22 = sadd.s32 1, %s1805_s17  ;;  %s28_s23 = sadd.s32 1, %s1809_s18 }
   0x7   : > { %p26_p0 = scmp.ge.s32.totalorder %s25_s22, 2  ;;  %p115_p1 = scmp.ne.s32.totalorder %s1793_s14, %s1789_s13 }
   0x8   : > { %p116_p2 = scmp.eq.s32.totalorder %s1540_s20, 3  ;;  %p121_p5 = scmp.ne.s32.totalorder %s1789_s13, %s1785_s12 }
   0x9   : > { %s2691_s22 = smov (%p26_p0, %s25_s22), 0  ;;  %s2693_s23 = smov (!%p26_p0, %s28_s23), %s1809_s18 }
   0xa   : > { %s101_s24 = ssub.s32 %s1805_s17, %s2691_s22  ;;  %p1896_p3 = por %p116_p2, %p115_p1 }
   0xb   : > { %p30_p4 = scmp.ge.s32.totalorder %s2693_s23, 2  ;;  %p122_p6 = scmp.eq.s32.totalorder %s1541_s21, 3 }
   0xc   : > { %p1544_p7 = scmp.ge.s32.totalorder %s1813_s19, 1  ;;  %p154_p9 = scmp.lt.s32.totalorder %s1813_s19, 5 }
   0xd   : > { %s2695_s23 = smov (%p30_p4, %s2693_s23), 0  ;;  %p1905_p8 = por %p122_p6, %p121_p5 }
   0xe   : > { %s100_s27 = ssub.s32 %s1809_s18, %s2695_s23  ;;  %s105_s28 = sadd.s32 1, %s1793_s14 }
   0xf   : > { %s102_s29 = sor.u32 %s101_s24, %s100_s27  ;;  %p155_p10 = pnand %p1544_p7, %p154_p9 }
  0x10   : > { %p103_p11 = scmp.eq.s32.totalorder %s102_s29, 0  ;;  %p178_p12 = scmp.lt.s32.totalorder (!%p155_p10), %s1801_s16, 1 }
  0x11   : > { %158 = sbr.rel (%p155_p10) target bundleno = 623 (0x26f), region = 32  ;;  %s1815_s11 = smov (!%p155_p10), 12  }
  0x12   : > { %s1914_s30 = scalar_select %p103_p11, %s1793_s14, %s105_s28  }
  0x13   : > { %s1587_s5 = smul.u32 (!%p155_p10), 96, %s1797_s15  ;;  %s1816_s20 = smov (!%p155_p10), 24  }
  0x14   : > { %s1817_s21 = smov (!%p155_p10), 4   ;;  %s1818_s24 = smov (!%p155_p10), 16  }
  0x15   : > { %s1819_s27 = smov (!%p155_p10), 28   ;;  %s1820_s28 = smov (!%p155_p10), 8  }
  0x16   : > { %s179_s4 = scalar_select %p178_p12, %s1801_s16, 1  ;;  %vm209_vm0 = vcmask 27648   ;;  %vm404_vm1 = vsmask.f32 3328  ;;  %vm405_vm2 = vsmask.f32 7440 }
  0x17   : > { %vm1998_vm3 = vmor %vm404_vm1, %vm405_vm2  ;;  %vm902_vm4 = vcmask 1042432   ;;  %vm903_vm5 = vcmask 1046532   ;;  %s1821_s29 = smov 20   ;;  %vm290_vm7 = vcmask 126048   ;;  %vm1271_vm8 = vcmask 1041408  }
  0x18   : > { %s1629_s6 = smul.u32 216, %s179_s4  ;;  %vm2133_vm6 = vmor %vm902_vm4, %vm903_vm5  ;;  %vm357_vm9 = vcmask 224448   ;;  %vm695_vm10 = vcmask 60448   ;;  %vm760_vm11 = vcmask 158848   ;;  %vm825_vm12 = vcmask 257248  }
  0x19   : > { %vm1023_vm13 = vcmask 93248   ;;  %vm1088_vm14 = vcmask 191648   ;;  %vm1153_vm15 = vcmask 290048  }
  0x1a   : > { %s182_s9 = scalar_lea.vmem %s2673_s0, %s1629_s6  ;;  %s1822_s6 = smov 32  }
  0x1b   : > { %s1922_s10 = scalar_lea.vmem %s182_s9, %s1587_s5  ;;  %s1582_s5 = sshll.u32 %s1797_s15, 4 }
  0x1c   : > { %v1925_v0 = vld [vmem:[%s1922_s10 + $0x3c] sm:$0xf]  ;;  %v191_v1 = vld [vmem:[%s1922_s10 + $0xc] sm:$0xf]  ;;  %v1929_v2 = vld [vmem:[%s1922_s10 + $0x40] sm:$0xf] }
  0x1d   : > { %258 = vrot.lane.b32.xlu1 %v1925_v0, %s1815_s11  ;;  %242 = vrot.lane.b32.xlu0 %v191_v1, %s1815_s11  ;;  %212 = vst.msk [vmem:[#allocation2 + $0x8] sm:$0xf] %vm209_vm0, %v191_v1  ;;  %220 = vst.msk [vmem:[#allocation2 + $0x28] sm:$0xf] %vm209_vm0, %v1925_v0  ;;  %v192_v3 = vld [vmem:[%s1922_s10 + $0x10] sm:$0xf] }
  0x1e   : > { %221 = vst.msk [vmem:[#allocation2 + $0x2c] sm:$0xf] %vm209_vm0, %v1929_v2  ;;  %v194_v4 = vld [vmem:[%s1922_s10 + $0x1c] sm:$0xf]  ;;  %213 = vst.msk [vmem:[#allocation2 + $0xc] sm:$0xf] %vm209_vm0, %v192_v3 }
  0x1f   : > { %215 = vst.msk [vmem:[#allocation2 + $0x14] sm:$0xf] %vm209_vm0, %v194_v4  ;;  %v193_v5 = vld [vmem:[%s1922_s10 + $0x18] sm:$0xf]  ;;  %v202_v6 = vld [vmem:[%s1922_s10 + $0x4c] sm:$0xf] }
  0x20   : > { %v201_v7 = vld [vmem:[%s1922_s10 + $0x48] sm:$0xf]  ;;  %214 = vst.msk [vmem:[#allocation2 + $0x10] sm:$0xf] %vm209_vm0, %v193_v5  ;;  %223 = vst.msk [vmem:[#allocation2 + $0x34] sm:$0xf] %vm209_vm0, %v202_v6 }
  0x21   : > { %222 = vst.msk [vmem:[#allocation2 + $0x30] sm:$0xf] %vm209_vm0, %v201_v7  ;;  %v1950_v8 = vld [vmem:[%s1922_s10 + $0x28] sm:$0xf]  ;;  %v1953_v9 = vld [vmem:[%s1922_s10 + $0x24] sm:$0xf]  ;;  %260 = vrot.lane.b32.xlu1 %v1929_v2, %s1815_s11  ;;  %244 = vrot.lane.b32.xlu0 %v192_v3, %s1815_s11 }
  0x22   : > { %v1956_v10 = vld [vmem:[%s1922_s10 + $0x58] sm:$0xf]  ;;  %217 = vst.msk [vmem:[#allocation2 + $0x1c] sm:$0xf] %vm209_vm0, %v1950_v8  ;;  %216 = vst.msk [vmem:[#allocation2 + $0x18] sm:$0xf] %vm209_vm0, %v1953_v9 }
  0x23   : > { %225 = vst.msk [vmem:[#allocation2 + $0x3c] sm:$0xf] %vm209_vm0, %v1956_v10  ;;  %v1965_v11 = vld [vmem:[%s1922_s10 + $0x54] sm:$0xf]  ;;  %v375_v12 = vld [vmem:[%s1922_s10 + $0x4] sm:$0xf] }
  0x24   : > { %224 = vst.msk [vmem:[#allocation2 + $0x38] sm:$0xf] %vm209_vm0, %v1965_v11  ;;  %v374_v13 = vld [vmem:[%s1922_s10] sm:$0xf]  ;;  %v417_v14 = vshll.u32 %v375_v12, 16  ;;  %v421_v15 = vshrl.u32 %v375_v12, 16 }
  0x25   : > { %248 = vrot.lane.b32.xlu1 %v194_v4, %s1815_s11  ;;  %246 = vrot.lane.b32.xlu0 %v193_v5, %s1815_s11  ;;  %v408_v16 = vshrl.u32 %v374_v13, 16  ;;  %v411_v17 = vshll.u32 %v374_v13, 16  ;;  %v387_v18 = vld [vmem:[%s1922_s10 + $0x34] sm:$0xf]  ;;  %v386_v19 = vld [vmem:[%s1922_s10 + $0x30] sm:$0xf] }
  0x26   : > { %v1980_v20 = vrot.slane %v417_v14, 5  ;;  %v423_v21 = vrot.slane %v421_v15, 4  ;;  %v376_v22 = vld [vmem:[%s1922_s10 + $0x8] sm:$0x1]  ;;  %v513_v25 = vshll.u32 %v387_v18, 16  ;;  %v517_v26 = vshrl.u32 %v387_v18, 16 }
  0x27   : > { %v410_v23 = vrot.slane %v408_v16, 4  ;;  %v413_v24 = vrot.slane %v411_v17, 5  ;;  %v504_v27 = vshrl.u32 %v386_v19, 16  ;;  %v507_v28 = vshll.u32 %v386_v19, 16  ;;  %v378_v29 = vld [vmem:[%s1922_s10 + $0x10] sm:$0xf] }
  0x28   : > { %v424_v30 = vor.u32 %v423_v21, %v1980_v20  ;;  %v427_v31 = vshll.u32 %v376_v22, 16  ;;  %v377_v32 = vld [vmem:[%s1922_s10 + $0xc] sm:$0xf]  ;;  %v388_v34 = vld [vmem:[%s1922_s10 + $0x38] sm:$0x1]  ;;  %v515_v35 = vrot.slane %v513_v25, 5 }
  0x29   : > { %264 = vrot.lane.b32.xlu1 %v202_v6, %s1815_s11  ;;  %262 = vrot.lane.b32.xlu0 %v201_v7, %s1815_s11  ;;  %v414_v33 = vor.u32 %v413_v24, %v410_v23  ;;  %v519_v36 = vrot.slane %v517_v26, 4  ;;  %v441_v37 = vshll.u32 %v378_v29, 16  ;;  %v506_v38 = vrot.slane %v504_v27, 4  ;;  %v390_v43 = vld [vmem:[%s1922_s10 + $0x40] sm:$0xf] }
  0x2a   : > { %v509_v39 = vrot.slane %v507_v28, 5  ;;  %v445_v40 = vshrl.u32 %v378_v29, 16  ;;  %v432_v41 = vshrl.u32 %v377_v32, 16  ;;  %v435_v42 = vshll.u32 %v377_v32, 16  ;;  %v389_v46 = vld [vmem:[%s1922_s10 + $0x3c] sm:$0xf] }
  0x2b   : > { %v429_v44 = vrot.slane %v427_v31, 5  ;;  %v523_v45 = vshll.u32 %v388_v34, 16  ;;  %v425_v47 = vrot.slane %v424_v30, 4  ;;  %v415_v48 = vrot.slane %v414_v33, 4  ;;  %v379_v53 = vld [vmem:[%s1922_s10 + $0x14] sm:$0x1] }
  0x2c   : > { %v520_v49 = vor.u32 %v519_v36, %v515_v35  ;;  %v443_v50 = vrot.slane %v441_v37, 5  ;;  %v510_v52 = vor.u32 %v509_v39, %v506_v38  ;;  %v447_v54 = vrot.slane %v445_v40, 4  ;;  %v391_v13 = vld [vmem:[%s1922_s10 + $0x44] sm:$0x1]  ;;  %v380_v25 = vld [vmem:[%s1922_s10 + $0x18] sm:$0xf] }
  0x2d   : > { %311 = vrot.lane.b32.xlu1 %v194_v4, %s1816_s20  ;;  %309 = vrot.lane.b32.xlu0 %v193_v5, %s1816_s20  ;;  %v537_v55 = vshll.u32 %v390_v43, 16  ;;  %v541_v56 = vshrl.u32 %v390_v43, 16  ;;  %v434_v57 = vrot.slane %v432_v41, 4  ;;  %v437_v58 = vrot.slane %v435_v42, 5  ;;  %v392_v36 = vld [vmem:[%s1922_s10 + $0x48] sm:$0xf] }
  0x2e   : > { %v528_v59 = vshrl.u32 %v389_v46, 16  ;;  %v531_v60 = vshll.u32 %v389_v46, 16  ;;  %v430_v61 = vsel %vm1998_vm3, %v425_v47, %v429_v44  ;;  %v420_v62 = vsel %vm1998_vm3, %v415_v48, %v1980_v20  ;;  %v381_v20 = vld [vmem:[%s1922_s10 + $0x1c] sm:$0xf]  ;;  %v2036_v37 = vld [vmem:[%s1922_s10 + $0x30] sm:$0xf] }
  0x2f   : > { %v525_v63 = vrot.slane %v523_v45, 5  ;;  %v451_v1 = vshll.u32 %v379_v53, 16  ;;  %v521_v3 = vrot.slane %v520_v49, 4  ;;  %v511_v4 = vrot.slane %v510_v52, 4  ;;  %v382_v38 = vld [vmem:[%s1922_s10 + $0x20] sm:$0x1] }
  0x30   : > { %v539_v5 = vrot.slane %v537_v55, 5  ;;  %v438_v12 = vor.u32 %v437_v58, %v434_v57  ;;  %v530_v14 = vrot.slane %v528_v59, 4  ;;  %v533_v15 = vrot.slane %v531_v60, 5  ;;  %218 = vst.msk [vmem:[#allocation2 + $0x20] sm:$0xf] %vm209_vm0, %v2036_v37 }
  0x31   : > { %327 = vrot.lane.b32.xlu1 %v202_v6, %s1816_s20  ;;  %325 = vrot.lane.b32.xlu0 %v201_v7, %s1816_s20  ;;  %v543_v6 = vrot.slane %v541_v56, 4  ;;  %v448_v7 = vor.u32 %v447_v54, %v443_v50  ;;  %v2017_v16 = vsel %vm1998_vm3, %v521_v3, %v525_v63  ;;  %v453_v17 = vrot.slane %v451_v1, 5  ;;  %v189_v41 = vld [vmem:[%s1922_s10] sm:$0xf]  ;;  %v2050_v46 = vld [vmem:[%s1922_s10 + $0x34] sm:$0xf] }
  0x32   : > { %v547_v19 = vshll.u32 %v391_v13, 16  ;;  %v2022_v21 = vsel %vm1998_vm3, %v511_v4, %v515_v35  ;;  %v439_v23 = vrot.slane %v438_v12, 4  ;;  %v534_v24 = vor.u32 %v533_v15, %v530_v14  ;;  %v393_v35 = vld [vmem:[%s1922_s10 + $0x4c] sm:$0xf]  ;;  %210 = vst.msk [vmem:[#allocation2] sm:$0xf] %vm209_vm0, %v189_v41 }
  0x33   : > { %v544_v18 = vor.u32 %v543_v6, %v539_v5  ;;  %v449_v22 = vrot.slane %v448_v7, 4  ;;  %v465_v26 = vshll.u32 %v381_v20, 16  ;;  %v469_v27 = vshrl.u32 %v381_v20, 16  ;;  %219 = vst.msk [vmem:[#allocation2 + $0x24] sm:$0xf] %vm209_vm0, %v2050_v46 }
  0x34   : > { %v549_v29 = vrot.slane %v547_v19, 5  ;;  %v456_v30 = vshrl.u32 %v380_v25, 16  ;;  %v459_v31 = vshll.u32 %v380_v25, 16  ;;  %v444_v33 = vsel %vm1998_vm3, %v439_v23, %v443_v50  ;;  %v190_v52 = vld [vmem:[%s1922_s10 + $0x4] sm:$0xf] }
  0x35   : > { %315 = vrot.lane.b32.xlu1 %v1950_v8, %s1816_s20  ;;  %313 = vrot.lane.b32.xlu0 %v1953_v9, %s1816_s20  ;;  %v545_v28 = vrot.slane %v544_v18, 4  ;;  %v454_v32 = vsel %vm1998_vm3, %v449_v22, %v453_v17  ;;  %v535_v34 = vrot.slane %v534_v24, 4  ;;  %v467_v39 = vrot.slane %v465_v26, 5  ;;  %211 = vst.msk [vmem:[#allocation2 + $0x4] sm:$0xf] %vm209_vm0, %v190_v52 }
  0x36   : > { %v471_v40 = vrot.slane %v469_v27, 4  ;;  %v458_v43 = vrot.slane %v456_v30, 4  ;;  %v461_v44 = vrot.slane %v459_v31, 5  ;;  %v561_v45 = vshll.u32 %v393_v35, 16  ;;  %v394_v56 = vld [vmem:[%s1922_s10 + $0x50] sm:$0x1] }
  0x37   : > { %v2046_v42 = vsel %vm1998_vm3, %v545_v28, %v549_v29  ;;  %v2054_v47 = vsel %vm1998_vm3, %v535_v34, %v539_v5  ;;  %v565_v48 = vshrl.u32 %v393_v35, 16  ;;  %v552_v49 = vshrl.u32 %v392_v36, 16  ;;  %v384_v63 = vld [vmem:[%s1922_s10 + $0x28] sm:$0xf]  ;;  %v383_v6 = vld [vmem:[%s1922_s10 + $0x24] sm:$0xf] }
  0x38   : > { %v555_v50 = vshll.u32 %v392_v36, 16  ;;  %v472_v53 = vor.u32 %v471_v40, %v467_v39  ;;  %v475_v54 = vshll.u32 %v382_v38, 16  ;;  %v462_v55 = vor.u32 %v461_v44, %v458_v43  ;;  %v396_v22 = vld [vmem:[%s1922_s10 + $0x58] sm:$0xf]  ;;  %v395_v23 = vld [vmem:[%s1922_s10 + $0x54] sm:$0xf] }
  0x39   : > { %331 = vrot.lane.b32.xlu1 %v1956_v10, %s1816_s20  ;;  %329 = vrot.lane.b32.xlu0 %v1965_v11, %s1816_s20  ;;  %v563_v57 = vrot.slane %v561_v45, 5  ;;  %v567_v58 = vrot.slane %v565_v48, 4  ;;  %v554_v59 = vrot.slane %v552_v49, 4  ;;  %v489_v7 = vshll.u32 %v384_v63, 16 }
  0x3a   : > { %v557_v60 = vrot.slane %v555_v50, 5  ;;  %v473_v1 = vrot.slane %v472_v53, 4  ;;  %v463_v3 = vrot.slane %v462_v55, 4  ;;  %v493_v12 = vshrl.u32 %v384_v63, 16  ;;  %v855_v63 = vld [vmem:[%s1922_s10 + $0x34] sm:$0xf] }
  0x3b   : > { %v568_v4 = vor.u32 %v567_v58, %v563_v57  ;;  %v480_v14 = vshrl.u32 %v383_v6, 16  ;;  %v483_v15 = vshll.u32 %v383_v6, 16  ;;  %v491_v24 = vrot.slane %v489_v7, 5 }
  0x3c   : > { %v558_v5 = vor.u32 %v557_v60, %v554_v59  ;;  %v2079_v18 = vsel %vm1998_vm3, %v463_v3, %v467_v39  ;;  %v495_v25 = vrot.slane %v493_v12, 4  ;;  %v585_v28 = vshll.u32 %v396_v22, 16  ;;  %v397_v39 = vld [vmem:[%s1922_s10 + $0x5c] sm:$0x1] }
  0x3d   : > { %649 = vrot.lane.b32.xlu1 %v430_v61, %s1817_s21  ;;  %647 = vrot.lane.b32.xlu0 %v420_v62, %s1817_s21  ;;  %v477_v61 = vrot.slane %v475_v54, 5  ;;  %v571_v62 = vshll.u32 %v394_v56, 16  ;;  %v569_v19 = vrot.slane %v568_v4, 4  ;;  %v482_v26 = vrot.slane %v480_v14, 4  ;;  %v843_v54 = vld [vmem:[%s1922_s10 + $0x4] sm:$0xf] }
  0x3e   : > { %v559_v20 = vrot.slane %v558_v5, 4  ;;  %v485_v27 = vrot.slane %v483_v15, 5  ;;  %v589_v29 = vshrl.u32 %v396_v22, 16  ;;  %v579_v34 = vshll.u32 %v395_v23, 16  ;;  %v856_v14 = vld [vmem:[%s1922_s10 + $0x38] sm:$0x1] }
  0x3f   : > { %v573_v13 = vrot.slane %v571_v62, 5  ;;  %v2075_v17 = vsel %vm1998_vm3, %v473_v1, %v477_v61  ;;  %v496_v35 = vor.u32 %v495_v25, %v491_v24  ;;  %v587_v40 = vrot.slane %v585_v28, 5  ;;  %v844_v61 = vld [vmem:[%s1922_s10 + $0x8] sm:$0x1]  ;;  %v842_v62 = vld [vmem:[%s1922_s10] sm:$0xe] }
  0x40   : > { %v2093_v31 = vsel %vm1998_vm3, %v559_v20, %v563_v57  ;;  %v486_v38 = vor.u32 %v485_v27, %v482_v26  ;;  %v591_v41 = vrot.slane %v589_v29, 4  ;;  %v581_v44 = vrot.slane %v579_v34, 5  ;;  %v846_v15 = vld [vmem:[%s1922_s10 + $0x10] sm:$0xf]  ;;  %v847_v25 = vld [vmem:[%s1922_s10 + $0x14] sm:$0x1] }
  0x41   : > { %665 = vrot.lane.b32.xlu1 %v2017_v16, %s1817_s21  ;;  %663 = vrot.lane.b32.xlu0 %v2022_v21, %s1817_s21  ;;  %v2089_v30 = vsel %vm1998_vm3, %v569_v19, %v573_v13  ;;  %v595_v48 = vshll.u32 %v397_v39, 16  ;;  %v497_v49 = vrot.slane %v496_v35, 4  ;;  %v907_v56 = vrot.slane %v843_v54, 5  ;;  %v854_v13 = vld [vmem:[%s1922_s10 + $0x30] sm:$0xe] }
  0x42   : > { %v487_v50 = vrot.slane %v486_v38, 4  ;;  %v592_v52 = vor.u32 %v591_v41, %v587_v40  ;;  %v910_v1 = vrot.slane %v844_v61, 5  ;;  %v1550_v3 = vrot.slane %v842_v62, 9  ;;  %v845_v27 = vld [vmem:[%s1922_s10 + $0xc] sm:$0xe] }
  0x43   : > { %v597_v55 = vrot.slane %v595_v48, 5  ;;  %v909_v7 = vrot.slane %v907_v56, 4  ;;  %v935_v12 = vrot.slane %v855_v63, 5  ;;  %v1554_v20 = vrot.slane %v854_v13, 9  ;;  %v858_v28 = vld [vmem:[%s1922_s10 + $0x40] sm:$0xf] }
  0x44   : > { %v2116_v58 = vsel %vm1998_vm3, %v487_v50, %v491_v24  ;;  %v593_v59 = vrot.slane %v592_v52, 4  ;;  %v908_v19 = vsel %vm2133_vm6, %v1550_v3, %v907_v56  ;;  %v938_v24 = vrot.slane %v856_v14, 5  ;;  %v857_v39 = vld [vmem:[%s1922_s10 + $0x3c] sm:$0xe]  ;;  %v848_v54 = vld [vmem:[%s1922_s10 + $0x18] sm:$0xe] }
  0x45   : > { %653 = vrot.lane.b32.xlu1 %v454_v32, %s1817_s21  ;;  %651 = vrot.lane.b32.xlu0 %v444_v33, %s1817_s21  ;;  %v911_v22 = vsel %vm2133_vm6, %v909_v7, %v910_v1  ;;  %v914_v26 = vrot.slane %v846_v15, 5  ;;  %v2155_v29 = vsel %vm2133_vm6, %v1554_v20, %v935_v12  ;;  %v1551_v35 = vrot.slane %v845_v27, 9  ;;  %v849_v50 = vld [vmem:[%s1922_s10 + $0x1c] sm:$0xf]  ;;  %v862_v61 = vld [vmem:[%s1922_s10 + $0x50] sm:$0x1] }
  0x46   : > { %v2127_v4 = vsel %vm1998_vm3, %v593_v59, %v597_v55  ;;  %v942_v38 = vrot.slane %v858_v28, 5  ;;  %v921_v52 = vrot.slane %v849_v50, 5  ;;  %v861_v55 = vld [vmem:[%s1922_s10 + $0x4c] sm:$0xf]  ;;  %v860_v63 = vld [vmem:[%s1922_s10 + $0x48] sm:$0xe] }
  0x47   : > { %v916_v34 = vrot.slane %v914_v26, 4  ;;  %v949_v62 = vrot.slane %v861_v55, 5  ;;  %v952_v1 = vrot.slane %v862_v61, 5  ;;  %v1556_v13 = vrot.slane %v860_v63, 9  ;;  %v863_v50 = vld [vmem:[%s1922_s10 + $0x54] sm:$0xe] }
  0x48   : > { %v923_v56 = vrot.slane %v921_v52, 4  ;;  %v206_v63 = vld [vmem:[%s1922_s10 + $0x64] sm:$0xf]  ;;  %vm1246_vm0 = vcmask 293888  }
  0x49   : > { %669 = vrot.lane.b32.xlu1 %v2046_v42, %s1817_s21  ;;  %667 = vrot.lane.b32.xlu0 %v2054_v47, %s1817_s21  ;;  %v2215_v15 = vsel %vm2133_vm6, %v1556_v13, %v949_v62 }
  0x4d   : > { %714 = vrot.lane.b32.xlu1 %v454_v32, %s1818_s24  ;;  %712 = vrot.lane.b32.xlu0 %v444_v33, %s1818_s24  ;;  %v385_v32 = vld [vmem:[%s1922_s10 + $0x2c] sm:$0x1]  ;;  %v576_v33 = vshrl.u32 %v395_v23, 16  ;;  %v937_v23 = vrot.slane %v935_v12, 4  ;;  %v951_v12 = vrot.slane %v949_v62, 4 }
  0x4e   : > { %v499_v36 = vshll.u32 %v385_v32, 16  ;;  %v917_v32 = vrot.slane %v847_v25, 5  ;;  %v1713_v25 = vld [vmem:[%s2674_s1 + $0x8] sm:$0xff]  }
  0x4f   : > { %v578_v43 = vrot.slane %v576_v33, 4  ;;  %v2159_v33 = vsel %vm2133_vm6, %v937_v23, %v938_v24  ;;  %v2211_v14 = vsel %vm2133_vm6, %v951_v12, %v952_v1  ;;  %v852_v24 = vld [vmem:[%s1922_s10 + $0x28] sm:$0xf]  ;;  %v205_v1 = vld [vmem:[%s1922_s10 + $0x60] sm:$0xf] }
  0x50   : > { %v501_v45 = vrot.slane %v499_v36, 5  ;;  %v859_v36 = vld [vmem:[%s1922_s10 + $0x44] sm:$0x1]  ;;  %v918_v41 = vsel %vm2133_vm6, %v916_v34, %v917_v32  ;;  %v853_v32 = vld [vmem:[%s1922_s10 + $0x2c] sm:$0x1] }
  0x51   : > { %730 = vrot.lane.b32.xlu1 %v2046_v42, %s1818_s24  ;;  %728 = vrot.lane.b32.xlu0 %v2054_v47, %s1818_s24  ;;  %v582_v53 = vor.u32 %v581_v44, %v578_v43  ;;  %v915_v43 = vsel %vm2133_vm6, %v1551_v35, %v914_v26  ;;  %v944_v44 = vrot.slane %v942_v38, 4  ;;  %v928_v26 = vrot.slane %v852_v24, 5  ;;  %v851_v34 = vld [vmem:[%s1922_s10 + $0x24] sm:$0xe]  ;;  %v864_v35 = vld [vmem:[%s1922_s10 + $0x58] sm:$0xf] }
  0x52   : > { %v2112_v57 = vsel %vm1998_vm3, %v497_v49, %v501_v45  ;;  %v1555_v45 = vrot.slane %v857_v39, 9  ;;  %v931_v39 = vrot.slane %v853_v32, 5 }
  0x53   : > { %v583_v60 = vrot.slane %v582_v53, 4  ;;  %v850_v53 = vld [vmem:[%s1922_s10 + $0x20] sm:$0x1] }
  0x54   : > { %v2179_v49 = vsel %vm2133_vm6, %v1555_v45, %v942_v38  ;;  %v924_v59 = vrot.slane %v850_v53, 5  ;;  %v930_v38 = vrot.slane %v928_v26, 4 }
  0x55   : > { %718 = vrot.lane.b32.xlu1 %v2075_v17, %s1818_s24  ;;  %716 = vrot.lane.b32.xlu0 %v2079_v18, %s1818_s24  ;;  %v2131_v5 = vsel %vm1998_vm3, %v583_v60, %v587_v40  ;;  %v945_v40 = vrot.slane %v859_v36, 5  ;;  %v1552_v60 = vrot.slane %v848_v54, 9  ;;  %v1714_v36 = vld [vmem:[%s2674_s1] sm:$0xff]   ;;  %v1557_v54 = vrot.slane %v863_v50, 9  ;;  %v400_v50 = vld [vmem:[%s1922_s10 + $0x68] sm:$0x1] }
  0x56   : > { %v2199_v3 = vsel %vm2133_vm6, %v923_v56, %v924_v59 }
  0x57   : > { %v2175_v48 = vsel %vm2133_vm6, %v944_v44, %v945_v40  ;;  %v2203_v7 = vsel %vm2133_vm6, %v1552_v60, %v921_v52  ;;  %v1553_v40 = vrot.slane %v851_v34, 9  ;;  %v399_v34 = vld [vmem:[%s1922_s10 + $0x64] sm:$0xf] }
  0x59   : > { %734 = vrot.lane.b32.xlu1 %v2089_v30, %s1818_s24  ;;  %732 = vrot.lane.b32.xlu0 %v2093_v31, %s1818_s24  ;;  %v2264_v52 = vsel %vm2133_vm6, %v1553_v40, %v928_v26 }
  0x5d   : > { %779 = vrot.lane.b32.xlu1 %v2075_v17, %s1819_s27  ;;  %777 = vrot.lane.b32.xlu0 %v2079_v18, %s1819_s27 }
  0x61   : > { %795 = vrot.lane.b32.xlu1 %v2089_v30, %s1819_s27  ;;  %793 = vrot.lane.b32.xlu0 %v2093_v31, %s1819_s27 }
  0x65   : > { %783 = vrot.lane.b32.xlu1 %v2112_v57, %s1819_s27  ;;  %781 = vrot.lane.b32.xlu0 %v2116_v58, %s1819_s27 }
  0x69   : > { %799 = vrot.lane.b32.xlu1 %v2127_v4, %s1819_s27  ;;  %797 = vrot.lane.b32.xlu0 %v2131_v5, %s1819_s27 }
  0x6d   : > { %977 = vrot.lane.b32.xlu1 %v911_v22, %s1820_s28  ;;  %975 = vrot.lane.b32.xlu0 %v908_v19, %s1820_s28  ;;  %v1711_v19 = vld [vmem:[%s2674_s1 + $0x10] ss:$0 sps:$4 sm:$0x33]  }
  0x6e   : > { %1627 = vmatprep.subr.msk.bf16.mxu0 %vm1271_vm8, %v1711_v19  ;;  %v1273_v20 = vsel %vm1271_vm8, %v1711_v19, 0  ;;  %1628 = vmatprep.subr.msk.bf16.mxu1 %vm1271_vm8, %v1711_v19 }
  0x6f   : > { %1600 = vmatpush3.bf16.msra.mxu0 %v1273_v20  ;;  %1624 = vmatpush3.bf16.msra.mxu1 %v1273_v20 }
  0x70   : > { %1601 = vmatprep.subr.bf16.mxu0 %v1713_v25  ;;  %1622 = vmatprep.subr.bf16.mxu1 %v1713_v25 }
  0x71   : > { %993 = vrot.lane.b32.xlu1 %v2159_v33, %s1820_s28  ;;  %991 = vrot.lane.b32.xlu0 %v2155_v29, %s1820_s28 }
  0x73   : > { %1602 = vmatpush3.bf16.msra.mxu0 %v1713_v25  ;;  %1625 = vmatpush3.bf16.msra.mxu1 %v1713_v25 }
  0x74   : > { %1603 = vmatprep.subr.bf16.mxu0 %v1714_v36  ;;  %1623 = vmatprep.subr.bf16.mxu1 %v1714_v36 }
  0x75   : > { %981 = vrot.lane.b32.xlu1 %v918_v41, %s1820_s28  ;;  %979 = vrot.lane.b32.xlu0 %v915_v43, %s1820_s28 }
  0x77   : > { %1604 = vmatpush3.bf16.msra.mxu0 %v1714_v36  ;;  %1626 = vmatpush3.bf16.msra.mxu1 %v1714_v36 }
  0x79   : > { %997 = vrot.lane.b32.xlu1 %v2175_v48, %s1820_s28  ;;  %995 = vrot.lane.b32.xlu0 %v2179_v49, %s1820_s28 }
  0x7d   : > { %1042 = vrot.lane.b32.xlu1 %v918_v41, %s1821_s29  ;;  %1040 = vrot.lane.b32.xlu0 %v915_v43, %s1821_s29  ;;  %v865_v41 = vld [vmem:[%s1922_s10 + $0x5c] sm:$0x1]  ;;  %v956_v43 = vrot.slane %v864_v35, 5  ;;  %v398_v35 = vld [vmem:[%s1922_s10 + $0x60] sm:$0xf] }
  0x7f   : > { %v958_v53 = vrot.slane %v956_v43, 4 }
  0x81   : > { %1058 = vrot.lane.b32.xlu1 %v2175_v48, %s1821_s29  ;;  %1056 = vrot.lane.b32.xlu0 %v2179_v49, %s1821_s29 }
  0x85   : > { %1046 = vrot.lane.b32.xlu1 %v2199_v3, %s1821_s29  ;;  %1044 = vrot.lane.b32.xlu0 %v2203_v7, %s1821_s29 }
  0x89   : > { %1062 = vrot.lane.b32.xlu1 %v2211_v14, %s1821_s29  ;;  %1060 = vrot.lane.b32.xlu0 %v2215_v15, %s1821_s29 }
  0x8d   : > { %1107 = vrot.lane.b32.xlu1 %v2199_v3, %s1822_s6  ;;  %1105 = vrot.lane.b32.xlu0 %v2203_v7, %s1822_s6 }
  0x8f   : > { %v259_v22 = vpop.permute.xlu1 %258  ;;  %v243_v23 = vpop.permute.xlu0 %242 }
  0x90   : > { %299 = vst.msk [vmem:[#allocation2 + $0x20] sm:$0xf] %vm290_vm7, %v259_v22  ;;  %291 = vst.msk [vmem:[#allocation2] sm:$0xf] %vm290_vm7, %v243_v23 }
  0x91   : > { %1123 = vrot.lane.b32.xlu1 %v2211_v14, %s1822_s6  ;;  %1121 = vrot.lane.b32.xlu0 %v2215_v15, %s1822_s6 }
  0x93   : > { %v261_v27 = vpop.permute.xlu1 %260  ;;  %v245_v28 = vpop.permute.xlu0 %244 }
  0x94   : > { %300 = vst.msk [vmem:[#allocation2 + $0x24] sm:$0xf] %vm290_vm7, %v261_v27  ;;  %292 = vst.msk [vmem:[#allocation2 + $0x4] sm:$0xf] %vm290_vm7, %v245_v28 }
  0x95   : > { %252 = vrot.lane.b32.xlu1 %v1950_v8, %s1815_s11  ;;  %250 = vrot.lane.b32.xlu0 %v1953_v9, %s1815_s11  ;;  %v959_v8 = vrot.slane %v865_v41, 5  ;;  %v2260_v9 = vsel %vm2133_vm6, %v930_v38, %v931_v39  ;;  %v600_v38 = vshrl.u32 %v398_v35, 16  ;;  %v603_v39 = vshll.u32 %v398_v35, 16 }
  0x97   : > { %v249_v44 = vpop.permute.xlu1 %248  ;;  %v247_v45 = vpop.permute.xlu0 %246 }
  0x98   : > { %294 = vst.msk [vmem:[#allocation2 + $0xc] sm:$0xf] %vm290_vm7, %v249_v44  ;;  %293 = vst.msk [vmem:[#allocation2 + $0x8] sm:$0xf] %vm290_vm7, %v247_v45  ;;  %v602_v44 = vrot.slane %v600_v38, 4  ;;  %v605_v45 = vrot.slane %v603_v39, 5 }
  0x99   : > { %268 = vrot.lane.b32.xlu1 %v1956_v10, %s1815_s11  ;;  %266 = vrot.lane.b32.xlu0 %v1965_v11, %s1815_s11  ;;  %v2274_v10 = vsel %vm2133_vm6, %v958_v53, %v959_v8  ;;  %v2278_v11 = vsel %vm2133_vm6, %v1557_v54, %v956_v43 }
  0x9b   : > { %v265_v55 = vpop.permute.xlu1 %264  ;;  %v263_v56 = vpop.permute.xlu0 %262 }
  0x9c   : > { %302 = vst.msk [vmem:[#allocation2 + $0x2c] sm:$0xf] %vm290_vm7, %v265_v55  ;;  %301 = vst.msk [vmem:[#allocation2 + $0x28] sm:$0xf] %vm290_vm7, %v263_v56  ;;  %v619_v55 = vshll.u32 %v400_v50, 16  ;;  %v606_v56 = vor.u32 %v605_v45, %v602_v44 }
  0x9d   : > { %1111 = vrot.lane.b32.xlu1 %v2260_v9, %s1822_s6  ;;  %1109 = vrot.lane.b32.xlu0 %v2264_v52, %s1822_s6  ;;  %v867_v45 = vld [vmem:[%s1922_s10 + $0x64] sm:$0xf] }
  0x9e   : > { %v963_v50 = vrot.slane %v867_v45, 5 }
  0x9f   : > { %v312_v59 = vpop.permute.xlu1 %311  ;;  %v310_v60 = vpop.permute.xlu0 %309 }
  0xa0   : > { %359 = vst.msk [vmem:[#allocation2 + $0x4] sm:$0xf] %vm357_vm9, %v312_v59  ;;  %358 = vst.msk [vmem:[#allocation2] sm:$0xf] %vm357_vm9, %v310_v60 }
  0xa1   : > { %1127 = vrot.lane.b32.xlu1 %v2274_v10, %s1822_s6  ;;  %1125 = vrot.lane.b32.xlu0 %v2278_v11, %s1822_s6 }
  0xa3   : > { %v328_v61 = vpop.permute.xlu1 %327  ;;  %v326_v62 = vpop.permute.xlu0 %325 }
  0xa4   : > { %367 = vst.msk [vmem:[#allocation2 + $0x24] sm:$0xf] %vm357_vm9, %v328_v61  ;;  %366 = vst.msk [vmem:[#allocation2 + $0x20] sm:$0xf] %vm357_vm9, %v326_v62  ;;  %v607_v61 = vrot.slane %v606_v56, 4 }
  0xa5   : > { %256 = vrot.lane.b32.xlu1 %v2050_v46, %s1815_s11  ;;  %254 = vrot.lane.b32.xlu0 %v2036_v37, %s1815_s11 }
  0xa7   : > { %v316_v12 = vpop.permute.xlu1 %315  ;;  %v314_v13 = vpop.permute.xlu0 %313 }
  0xa8   : > { %361 = vst.msk [vmem:[#allocation2 + $0xc] sm:$0xf] %vm357_vm9, %v316_v12  ;;  %360 = vst.msk [vmem:[#allocation2 + $0x8] sm:$0xf] %vm357_vm9, %v314_v13  ;;  %v401_v12 = vld [vmem:[%s1922_s10 + $0x6c] sm:$0xf] }
  0xa9   : > { %272 = vrot.lane.b32.xlu1 %v206_v63, %s1815_s11  ;;  %270 = vrot.lane.b32.xlu0 %v205_v1, %s1815_s11 }
  0xab   : > { %v332_v19 = vpop.permute.xlu1 %331  ;;  %v330_v20 = vpop.permute.xlu0 %329 }
  0xac   : > { %369 = vst.msk [vmem:[#allocation2 + $0x2c] sm:$0xf] %vm357_vm9, %v332_v19  ;;  %368 = vst.msk [vmem:[#allocation2 + $0x28] sm:$0xf] %vm357_vm9, %v330_v20  ;;  %v624_v20 = vshrl.u32 %v401_v12, 16 }
  0xad   : > { %319 = vrot.lane.b32.xlu1 %v2050_v46, %s1816_s20  ;;  %317 = vrot.lane.b32.xlu0 %v2036_v37, %s1816_s20  ;;  %v208_v37 = vld [vmem:[%s1922_s10 + $0x70] sm:$0xf]  ;;  %v207_v46 = vld [vmem:[%s1922_s10 + $0x6c] sm:$0xf] }
  0xaf   : > { %v650_v22 = vpop.permute.xlu1 %649  ;;  %v648_v23 = vpop.permute.xlu0 %647 }
  0xb0   : > { %697 = vst.msk [vmem:[#allocation2 + $0x4] sm:$0xf] %vm695_vm10, %v650_v22  ;;  %696 = vst.msk [vmem:[#allocation2] sm:$0xf] %vm695_vm10, %v648_v23  ;;  %v627_v22 = vshll.u32 %v401_v12, 16 }
  0xb1   : > { %335 = vrot.lane.b32.xlu1 %v206_v63, %s1816_s20  ;;  %333 = vrot.lane.b32.xlu0 %v205_v1, %s1816_s20  ;;  %v402_v1 = vld [vmem:[%s1922_s10 + $0x70] sm:$0xf] }
  0xb2   : > { %v633_v13 = vshll.u32 %v402_v1, 16  ;;  %v637_v19 = vshrl.u32 %v402_v1, 16 }
  0xb3   : > { %v666_v24 = vpop.permute.xlu1 %665  ;;  %v664_v25 = vpop.permute.xlu0 %663 }
  0xb4   : > { %705 = vst.msk [vmem:[#allocation2 + $0x24] sm:$0xf] %vm695_vm10, %v666_v24  ;;  %704 = vst.msk [vmem:[#allocation2 + $0x20] sm:$0xf] %vm695_vm10, %v664_v25  ;;  %v635_v25 = vrot.slane %v633_v13, 5 }
  0xb5   : > { %323 = vrot.lane.b32.xlu1 %v1929_v2, %s1816_s20  ;;  %321 = vrot.lane.b32.xlu0 %v1925_v0, %s1816_s20 }
  0xb7   : > { %v654_v26 = vpop.permute.xlu1 %653  ;;  %v652_v27 = vpop.permute.xlu0 %651 }
  0xb8   : > { %699 = vst.msk [vmem:[#allocation2 + $0xc] sm:$0xf] %vm695_vm10, %v654_v26  ;;  %698 = vst.msk [vmem:[#allocation2 + $0x8] sm:$0xf] %vm695_vm10, %v652_v27  ;;  %v629_v26 = vrot.slane %v627_v22, 5 }
  0xb9   : > { %339 = vrot.lane.b32.xlu1 %v208_v37, %s1816_s20  ;;  %337 = vrot.lane.b32.xlu0 %v207_v46, %s1816_s20  ;;  %v639_v37 = vrot.slane %v637_v19, 4  ;;  %v626_v46 = vrot.slane %v624_v20, 4  ;;  %v871_v19 = vld [vmem:[%s1922_s10 + $0x74] sm:$0x1]  ;;  %v869_v20 = vld [vmem:[%s1922_s10 + $0x6c] sm:$0xe] }
  0xbb   : > { %v670_v28 = vpop.permute.xlu1 %669  ;;  %v668_v32 = vpop.permute.xlu0 %667 }
  0xbc   : > { %707 = vst.msk [vmem:[#allocation2 + $0x2c] sm:$0xf] %vm695_vm10, %v670_v28  ;;  %706 = vst.msk [vmem:[#allocation2 + $0x28] sm:$0xf] %vm695_vm10, %v668_v32  ;;  %v403_v32 = vld [vmem:[%s1922_s10 + $0x74] sm:$0x1] }
  0xbd   : > { %657 = vrot.lane.b32.xlu1 %v2075_v17, %s1817_s21  ;;  %655 = vrot.lane.b32.xlu0 %v2079_v18, %s1817_s21  ;;  %v609_v18 = vshll.u32 %v399_v34, 16 }
  0xbf   : > { %v715_v0 = vpop.permute.xlu1 %714  ;;  %v713_v2 = vpop.permute.xlu0 %712  ;;  %v611_v41 = vrot.slane %v609_v18, 5 }
  0xc0   : > { %762 = vst.msk [vmem:[#allocation2 + $0x4] sm:$0xf] %vm760_vm11, %v715_v0  ;;  %761 = vst.msk [vmem:[#allocation2] sm:$0xf] %vm760_vm11, %v713_v2  ;;  %v640_v0 = vor.u32 %v639_v37, %v635_v25  ;;  %v643_v2 = vshll.u32 %v403_v32, 16 }
  0xc1   : > { %673 = vrot.lane.b32.xlu1 %v2089_v30, %s1817_s21  ;;  %671 = vrot.lane.b32.xlu0 %v2093_v31, %s1817_s21  ;;  %v613_v30 = vshrl.u32 %v399_v34, 16  ;;  %v630_v34 = vor.u32 %v629_v26, %v626_v46 }
  0xc2   : > { %v645_v18 = vrot.slane %v643_v2, 5 }
  0xc3   : > { %v731_v36 = vpop.permute.xlu1 %730  ;;  %v729_v17 = vpop.permute.xlu0 %728  ;;  %v615_v43 = vrot.slane %v613_v30, 4 }
  0xc4   : > { %770 = vst.msk [vmem:[#allocation2 + $0x24] sm:$0xf] %vm760_vm11, %v731_v36  ;;  %769 = vst.msk [vmem:[#allocation2 + $0x20] sm:$0xf] %vm760_vm11, %v729_v17  ;;  %v641_v17 = vrot.slane %v640_v0, 4 }
  0xc5   : > { %661 = vrot.lane.b32.xlu1 %v2112_v57, %s1817_s21  ;;  %659 = vrot.lane.b32.xlu0 %v2116_v58, %s1817_s21  ;;  %v616_v54 = vor.u32 %v615_v43, %v611_v41 }
  0xc7   : > { %v719_v31 = vpop.permute.xlu1 %718  ;;  %v717_v40 = vpop.permute.xlu0 %716 }
  0xc8   : > { %764 = vst.msk [vmem:[#allocation2 + $0xc] sm:$0xf] %vm760_vm11, %v719_v31  ;;  %763 = vst.msk [vmem:[#allocation2 + $0x8] sm:$0xf] %vm760_vm11, %v717_v40 }
  0xc9   : > { %677 = vrot.lane.b32.xlu1 %v2127_v4, %s1817_s21  ;;  %675 = vrot.lane.b32.xlu0 %v2131_v5, %s1817_s21  ;;  %s1823_s21 = smov [#allocation3]  }
  0xcb   : > { %v735_v8 = vpop.permute.xlu1 %734  ;;  %v733_v53 = vpop.permute.xlu0 %732 }
  0xcc   : > { %772 = vst.msk [vmem:[#allocation2 + $0x2c] sm:$0xf] %vm760_vm11, %v735_v8  ;;  %771 = vst.msk [vmem:[#allocation2 + $0x28] sm:$0xf] %vm760_vm11, %v733_v53 }
  0xcd   : > { %722 = vrot.lane.b32.xlu1 %v2112_v57, %s1818_s24  ;;  %720 = vrot.lane.b32.xlu0 %v2116_v58, %s1818_s24  ;;  %v617_v57 = vrot.slane %v616_v54, 4  ;;  %v621_v58 = vrot.slane %v619_v55, 5  ;;  %v868_v54 = vld [vmem:[%s1922_s10 + $0x68] sm:$0x1]  ;;  %v866_v55 = vld [vmem:[%s1922_s10 + $0x60] sm:$0xe] }
  0xce   : > { %v966_v56 = vrot.slane %v868_v54, 5 }
  0xcf   : > { %v780_v59 = vpop.permute.xlu1 %779  ;;  %v778_v60 = vpop.permute.xlu0 %777 }
  0xd0   : > { %827 = vst.msk [vmem:[#allocation2 + $0x4] sm:$0xf] %vm825_vm12, %v780_v59  ;;  %826 = vst.msk [vmem:[#allocation2] sm:$0xf] %vm825_vm12, %v778_v60  ;;  %v1558_v59 = vrot.slane %v866_v55, 9 }
  0xd1   : > { %738 = vrot.lane.b32.xlu1 %v2127_v4, %s1818_s24  ;;  %736 = vrot.lane.b32.xlu0 %v2131_v5, %s1818_s24  ;;  %v622_v4 = vsel %vm1998_vm3, %v617_v57, %v621_v58  ;;  %v612_v5 = vsel %vm1998_vm3, %v607_v61, %v611_v41 }
  0xd3   : > { %v796_v62 = vpop.permute.xlu1 %795  ;;  %v794_v63 = vpop.permute.xlu0 %793 }
  0xd4   : > { %835 = vst.msk [vmem:[#allocation2 + $0x24] sm:$0xf] %vm825_vm12, %v796_v62  ;;  %834 = vst.msk [vmem:[#allocation2 + $0x20] sm:$0xf] %vm825_vm12, %v794_v63  ;;  %v870_v62 = vld [vmem:[%s1922_s10 + $0x70] sm:$0xf] }
  0xd5   : > { %726 = vrot.lane.b32.xlu1 %v2017_v16, %s1818_s24  ;;  %724 = vrot.lane.b32.xlu0 %v2022_v21, %s1818_s24  ;;  %s175_s10 = sand.u32 1, %s1789_s13  }
  0xd6   : > { %s2621_s11 = scalar_lea.sflag [#allocation4], %s175_s10 }
  0xd7   : > { %v784_v23 = vpop.permute.xlu1 %783  ;;  %v782_v24 = vpop.permute.xlu0 %781 }
  0xd8   : > { %829 = vst.msk [vmem:[#allocation2 + $0xc] sm:$0xf] %vm825_vm12, %v784_v23  ;;  %828 = vst.msk [vmem:[#allocation2 + $0x8] sm:$0xf] %vm825_vm12, %v782_v24  ;;  %v1559_v23 = vrot.slane %v869_v20, 9 }
  0xd9   : > { %742 = vrot.lane.b32.xlu1 %v622_v4, %s1818_s24  ;;  %740 = vrot.lane.b32.xlu0 %v612_v5, %s1818_s24  ;;  %s1725_s24 = sshll.u32 %s1823_s21, 4  ;;  %s1726_s24 = int_to_ptr.vmem [resolvable:$false] %s1725_s24 }
  0xdb   : > { %v800_v27 = vpop.permute.xlu1 %799  ;;  %v798_v28 = vpop.permute.xlu0 %797 }
  0xdc   : > { %837 = vst.msk [vmem:[#allocation2 + $0x2c] sm:$0xf] %vm825_vm12, %v800_v27  ;;  %836 = vst.msk [vmem:[#allocation2 + $0x28] sm:$0xf] %vm825_vm12, %v798_v28 }
  0xdd   : > { %787 = vrot.lane.b32.xlu1 %v2017_v16, %s1819_s27  ;;  %785 = vrot.lane.b32.xlu0 %v2022_v21, %s1819_s27  ;;  %v631_v16 = vrot.slane %v630_v34, 4  ;;  %v646_v21 = vsel %vm1998_vm3, %v641_v17, %v645_v18 }
  0xdf   : > { %v978_v35 = vpop.permute.xlu1 %977  ;;  %v976_v36 = vpop.permute.xlu0 %975  ;;  %v636_v39 = vsel %vm1998_vm3, %v631_v16, %v635_v25 }
  0xe0   : > { %1025 = vst.msk [vmem:[#allocation2 + $0x4] sm:$0xf] %vm1023_vm13, %v978_v35  ;;  %1024 = vst.msk [vmem:[#allocation2] sm:$0xf] %vm1023_vm13, %v976_v36 }
  0xe1   : > { %803 = vrot.lane.b32.xlu1 %v622_v4, %s1819_s27  ;;  %801 = vrot.lane.b32.xlu0 %v612_v5, %s1819_s27  ;;  %v970_v4 = vrot.slane %v870_v62, 5 }
  0xe3   : > { %v994_v30 = vpop.permute.xlu1 %993  ;;  %v992_v38 = vpop.permute.xlu0 %991  ;;  %v972_v22 = vrot.slane %v970_v4, 4  ;;  %v971_v37 = vsel %vm2133_vm6, %v1559_v23, %v970_v4 }
  0xe4   : > { %1033 = vst.msk [vmem:[#allocation2 + $0x24] sm:$0xf] %vm1023_vm13, %v994_v30  ;;  %1032 = vst.msk [vmem:[#allocation2 + $0x20] sm:$0xf] %vm1023_vm13, %v992_v38 }
  0xe5   : > { %791 = vrot.lane.b32.xlu1 %v2046_v42, %s1819_s27  ;;  %789 = vrot.lane.b32.xlu0 %v2054_v47, %s1819_s27 }
  0xe7   : > { %v982_v31 = vpop.permute.xlu1 %981  ;;  %v980_v40 = vpop.permute.xlu0 %979 }
  0xe8   : > { %1027 = vst.msk [vmem:[#allocation2 + $0xc] sm:$0xf] %vm1023_vm13, %v982_v31  ;;  %1026 = vst.msk [vmem:[#allocation2 + $0x8] sm:$0xf] %vm1023_vm13, %v980_v40 }
  0xe9   : > { %807 = vrot.lane.b32.xlu1 %v646_v21, %s1819_s27  ;;  %805 = vrot.lane.b32.xlu0 %v636_v39, %s1819_s27  ;;  %s1545_s27 = sshll.u32 %s175_s10, 7 }
  0xeb   : > { %v998_v42 = vpop.permute.xlu1 %997  ;;  %v996_v41 = vpop.permute.xlu0 %995 }
  0xec   : > { %1035 = vst.msk [vmem:[#allocation2 + $0x2c] sm:$0xf] %vm1023_vm13, %v998_v42  ;;  %1034 = vst.msk [vmem:[#allocation2 + $0x28] sm:$0xf] %vm1023_vm13, %v996_v41 }
  0xed   : > { %985 = vrot.lane.b32.xlu1 %v2199_v3, %s1820_s28  ;;  %983 = vrot.lane.b32.xlu0 %v2203_v7, %s1820_s28 }
  0xef   : > { %v1043_v51 = vpop.permute.xlu1 %1042  ;;  %v1041_v47 = vpop.permute.xlu0 %1040 }
  0xf0   : > { %1090 = vst.msk [vmem:[#allocation2 + $0x4] sm:$0xf] %vm1088_vm14, %v1043_v51  ;;  %1089 = vst.msk [vmem:[#allocation2] sm:$0xf] %vm1088_vm14, %v1041_v47 }
  0xf1   : > { %1001 = vrot.lane.b32.xlu1 %v2211_v14, %s1820_s28  ;;  %999 = vrot.lane.b32.xlu0 %v2215_v15, %s1820_s28 }
  0xf3   : > { %v1059_v43 = vpop.permute.xlu1 %1058  ;;  %v1057_v44 = vpop.permute.xlu0 %1056 }
  0xf4   : > { %1098 = vst.msk [vmem:[#allocation2 + $0x24] sm:$0xf] %vm1088_vm14, %v1059_v43  ;;  %1097 = vst.msk [vmem:[#allocation2 + $0x20] sm:$0xf] %vm1088_vm14, %v1057_v44 }
  0xf5   : > { %989 = vrot.lane.b32.xlu1 %v2260_v9, %s1820_s28  ;;  %987 = vrot.lane.b32.xlu0 %v2264_v52, %s1820_s28 }
  0xf7   : > { %v1047_v3 = vpop.permute.xlu1 %1046  ;;  %v1045_v7 = vpop.permute.xlu0 %1044 }
  0xf8   : > { %1092 = vst.msk [vmem:[#allocation2 + $0xc] sm:$0xf] %vm1088_vm14, %v1047_v3  ;;  %1091 = vst.msk [vmem:[#allocation2 + $0x8] sm:$0xf] %vm1088_vm14, %v1045_v7 }
  0xf9   : > { %1005 = vrot.lane.b32.xlu1 %v2274_v10, %s1820_s28  ;;  %1003 = vrot.lane.b32.xlu0 %v2278_v11, %s1820_s28 }
  0xfb   : > { %v1063_v14 = vpop.permute.xlu1 %1062  ;;  %v1061_v15 = vpop.permute.xlu0 %1060 }
  0xfc   : > { %1100 = vst.msk [vmem:[#allocation2 + $0x2c] sm:$0xf] %vm1088_vm14, %v1063_v14  ;;  %1099 = vst.msk [vmem:[#allocation2 + $0x28] sm:$0xf] %vm1088_vm14, %v1061_v15 }
  0xfd   : > { %1050 = vrot.lane.b32.xlu1 %v2260_v9, %s1821_s29  ;;  %1048 = vrot.lane.b32.xlu0 %v2264_v52, %s1821_s29  ;;  %v965_v9 = vrot.slane %v963_v50, 4 }
  0xff   : > { %v1108_v8 = vpop.permute.xlu1 %1107  ;;  %v1106_v53 = vpop.permute.xlu0 %1105 }
 0x100   : > { %1155 = vst.msk [vmem:[#allocation2 + $0x4] sm:$0xf] %vm1153_vm15, %v1108_v8  ;;  %1154 = vst.msk [vmem:[#allocation2] sm:$0xf] %vm1153_vm15, %v1106_v53 }
 0x101   : > { %1066 = vrot.lane.b32.xlu1 %v2274_v10, %s1821_s29  ;;  %1064 = vrot.lane.b32.xlu0 %v2278_v11, %s1821_s29  ;;  %v967_v10 = vsel %vm2133_vm6, %v965_v9, %v966_v56  ;;  %v964_v11 = vsel %vm2133_vm6, %v1558_v59, %v963_v50 }
 0x103   : > { %v1124_v52 = vpop.permute.xlu1 %1123  ;;  %v1122_v60 = vpop.permute.xlu0 %1121 }
 0x104   : > { %1163 = vst.msk [vmem:[#allocation2 + $0x24] sm:$0xf] %vm1153_vm15, %v1124_v52  ;;  %1162 = vst.msk [vmem:[#allocation2 + $0x20] sm:$0xf] %vm1153_vm15, %v1122_v60 }
 0x105   : > { %1054 = vrot.lane.b32.xlu1 %v2159_v33, %s1821_s29  ;;  %1052 = vrot.lane.b32.xlu0 %v2155_v29, %s1821_s29 }
 0x107   : > { %v253_v57 = vpop.permute.xlu1 %252  ;;  %v251_v58 = vpop.permute.xlu0 %250  ;;  %v1710_v61 = vld [vmem:[#allocation2] sm:$0xff]  }
 0x108   : > { %296 = vst.msk [vmem:[#allocation2 + $0x14] sm:$0xf] %vm290_vm7, %v253_v57  ;;  %295 = vst.msk [vmem:[#allocation2 + $0x10] sm:$0xf] %vm290_vm7, %v251_v58  ;;  %1605 = vmatprep.mubr.msk.bf16.mxu0 %vm1246_vm0, %v1710_v61 }
 0x109   : > { %1070 = vrot.lane.b32.xlu1 %v967_v10, %s1821_s29  ;;  %1068 = vrot.lane.b32.xlu0 %v964_v11, %s1821_s29  ;;  %s2567_s29 = scalar_lea.vmem [#allocation3], %s1545_s27  ;;  %s1727_s27 = scalar_lea.vmem %s1726_s24, 4096 }
 0x10b   : > { %v269_v63 = vpop.permute.xlu1 %268  ;;  %v267_v1 = vpop.permute.xlu0 %266  ;;  %v1712_v12 = vld [vmem:[#allocation2 + $0x20] sm:$0xff]  }
 0x10c   : > { %304 = vst.msk [vmem:[#allocation2 + $0x34] sm:$0xf] %vm290_vm7, %v269_v63  ;;  %303 = vst.msk [vmem:[#allocation2 + $0x30] sm:$0xf] %vm290_vm7, %v267_v1  ;;  %1613 = vmatprep.mubr.msk.bf16.mxu1 %vm1246_vm0, %v1712_v12 }
 0x10d   : > { %1115 = vrot.lane.b32.xlu1 %v2159_v33, %s1822_s6  ;;  %1113 = vrot.lane.b32.xlu0 %v2155_v29, %s1822_s6  ;;  %v973_v33 = vrot.slane %v871_v19, 5 }
 0x10f   : > { %v1112_v5 = vpop.permute.xlu1 %1111  ;;  %v1110_v13 = vpop.permute.xlu0 %1109  ;;  %v974_v25 = vsel %vm2133_vm6, %v972_v22, %v973_v33 }
 0x110   : > { %1157 = vst.msk [vmem:[#allocation2 + $0xc] sm:$0xf] %vm1153_vm15, %v1112_v5  ;;  %1156 = vst.msk [vmem:[#allocation2 + $0x8] sm:$0xf] %vm1153_vm15, %v1110_v13 }
 0x111   : > { %1131 = vrot.lane.b32.xlu1 %v967_v10, %s1822_s6  ;;  %1129 = vrot.lane.b32.xlu0 %v964_v11, %s1822_s6 }
 0x113   : > { %v1128_v24 = vpop.permute.xlu1 %1127  ;;  %v1126_v29 = vpop.permute.xlu0 %1125 }
 0x114   : > { %1165 = vst.msk [vmem:[#allocation2 + $0x2c] sm:$0xf] %vm1153_vm15, %v1128_v24  ;;  %1164 = vst.msk [vmem:[#allocation2 + $0x28] sm:$0xf] %vm1153_vm15, %v1126_v29 }
 0x115   : > { %1119 = vrot.lane.b32.xlu1 %v2175_v48, %s1822_s6  ;;  %1117 = vrot.lane.b32.xlu0 %v2179_v49, %s1822_s6 }
 0x117   : > { %v257_v46 = vpop.permute.xlu1 %256  ;;  %v255_v26 = vpop.permute.xlu0 %254  ;;  %v1715_v27 = vld [vmem:[#allocation2 + $0x8] sm:$0xff]  }
 0x118   : > { %298 = vst.msk [vmem:[#allocation2 + $0x1c] sm:$0xf] %vm290_vm7, %v257_v46  ;;  %297 = vst.msk [vmem:[#allocation2 + $0x18] sm:$0xf] %vm290_vm7, %v255_v26  ;;  %1606 = vmatmul.mubr.msk.bf16.vlgmr.msra.gmra.mxu0 %vm1246_vm0, %v1715_v27  ;;  %v2550_v27 = vld [vmem:[%s2675_s2] ss:$0 sm:$0xff] }
 0x119   : > { %1135 = vrot.lane.b32.xlu1 %v974_v25, %s1822_s6  ;;  %1133 = vrot.lane.b32.xlu0 %v971_v37, %s1822_s6  ;;  %s1583_s6 = sshll.u32 %s1801_s16, 5  ;;  %s1462_s16 = sshll.u32 %s2567_s29, 4  ;;  %s2616_s16 = int_to_ptr.vmem [resolvable:$true] %s1462_s16 }
 0x11a   : > { %s1459_s7 = sadd.s32 %s1583_s6, %s1582_s5  ;;  %s1721_s20 = scalar_lea.vmem %s2616_s16, 2048 }
 0x11b   : > { %v273_v48 = vpop.permute.xlu1 %272  ;;  %v271_v49 = vpop.permute.xlu0 %270  ;;  %v1716_v28 = vld [vmem:[#allocation2 + $0x28] sm:$0xff]   ;;  %s1584_s15 = sshll.u32 %s1459_s7, 7  ;;  %p1722_p13 = scmp.ne.s32.totalorder %s2616_s16, %s1721_s20 }
 0x11c   : > { %306 = vst.msk [vmem:[#allocation2 + $0x3c] sm:$0xf] %vm290_vm7, %v273_v48  ;;  %305 = vst.msk [vmem:[#allocation2 + $0x38] sm:$0xf] %vm290_vm7, %v271_v49  ;;  %1614 = vmatmul.mubr.msk.bf16.vlgmr.msra.gmra.mxu1 %vm1246_vm0, %v1716_v28  ;;  %v2555_v49 = vld [vmem:[%s2675_s2 + $0x1] ss:$0 sm:$0xff]  ;;  %s2613_s4 = scalar_lea.hbm %s2676_s3, %s1584_s15  ;;  %p1728_p2 = scmp.lt.s32.totalorder %s2616_s16, %s1726_s24 }
 0x11d   : > { %p1723_p0 = pnand %p1722_p13, %p1896_p3  ;;  %p1729_p4 = scmp.lt.s32.totalorder %s1727_s27, %s1721_s20 }
 0x11f   : > { %v320_v6 = vpop.permute.xlu1 %319  ;;  %v318_v32 = vpop.permute.xlu0 %317  ;;  %p1724_p1 = pneg %p1723_p0  ;;  %p1730_p5 = por %p1729_p4, %p1728_p2 }
 0x120   : > { %363 = vst.msk [vmem:[#allocation2 + $0x14] sm:$0xf] %vm357_vm9, %v320_v6  ;;  %362 = vst.msk [vmem:[#allocation2 + $0x10] sm:$0xf] %vm357_vm9, %v318_v32 }
 0x121   : > { %p1731_p6 = pnand %p1730_p5, %p1724_p1 }
 0x123   : > { %v336_v0 = vpop.permute.xlu1 %335  ;;  %v334_v2 = vpop.permute.xlu0 %333 }
 0x124   : > { %371 = vst.msk [vmem:[#allocation2 + $0x34] sm:$0xf] %vm357_vm9, %v336_v0  ;;  %370 = vst.msk [vmem:[#allocation2 + $0x30] sm:$0xf] %vm357_vm9, %v334_v2 }
 0x127   : > { %v324_v34 = vpop.permute.xlu1 %323  ;;  %v322_v35 = vpop.permute.xlu0 %321 }
 0x128   : > { %365 = vst.msk [vmem:[#allocation2 + $0x1c] sm:$0xf] %vm357_vm9, %v324_v34  ;;  %364 = vst.msk [vmem:[#allocation2 + $0x18] sm:$0xf] %vm357_vm9, %v322_v35 }
 0x12b   : > { %v340_v36 = vpop.permute.xlu1 %339  ;;  %v338_v17 = vpop.permute.xlu0 %337 }
 0x12c   : > { %373 = vst.msk [vmem:[#allocation2 + $0x3c] sm:$0xf] %vm357_vm9, %v340_v36  ;;  %372 = vst.msk [vmem:[#allocation2 + $0x38] sm:$0xf] %vm357_vm9, %v338_v17 }
 0x12f   : > { %v658_v18 = vpop.permute.xlu1 %657  ;;  %v656_v16 = vpop.permute.xlu0 %655 }
 0x130   : > { %701 = vst.msk [vmem:[#allocation2 + $0x14] sm:$0xf] %vm695_vm10, %v658_v18  ;;  %700 = vst.msk [vmem:[#allocation2 + $0x10] sm:$0xf] %vm695_vm10, %v656_v16 }
 0x133   : > { %v674_v30 = vpop.permute.xlu1 %673  ;;  %v672_v38 = vpop.permute.xlu0 %671 }
 0x134   : > { %709 = vst.msk [vmem:[#allocation2 + $0x34] sm:$0xf] %vm695_vm10, %v674_v30  ;;  %708 = vst.msk [vmem:[#allocation2 + $0x30] sm:$0xf] %vm695_vm10, %v672_v38 }
 0x137   : > { %v662_v21 = vpop.permute.xlu1 %661  ;;  %v660_v39 = vpop.permute.xlu0 %659 }
 0x138   : > { %703 = vst.msk [vmem:[#allocation2 + $0x1c] sm:$0xf] %vm695_vm10, %v662_v21  ;;  %702 = vst.msk [vmem:[#allocation2 + $0x18] sm:$0xf] %vm695_vm10, %v660_v39 }
 0x13b   : > { %v678_v31 = vpop.permute.xlu1 %677  ;;  %v676_v40 = vpop.permute.xlu0 %675 }
 0x13c   : > { %711 = vst.msk [vmem:[#allocation2 + $0x3c] sm:$0xf] %vm695_vm10, %v678_v31  ;;  %710 = vst.msk [vmem:[#allocation2 + $0x38] sm:$0xf] %vm695_vm10, %v676_v40 }
 0x13f   : > { %v723_v42 = vpop.permute.xlu1 %722  ;;  %v721_v41 = vpop.permute.xlu0 %720 }
 0x140   : > { %766 = vst.msk [vmem:[#allocation2 + $0x14] sm:$0xf] %vm760_vm11, %v723_v42  ;;  %765 = vst.msk [vmem:[#allocation2 + $0x10] sm:$0xf] %vm760_vm11, %v721_v41 }
 0x143   : > { %v739_v51 = vpop.permute.xlu1 %738  ;;  %v737_v47 = vpop.permute.xlu0 %736 }
 0x144   : > { %774 = vst.msk [vmem:[#allocation2 + $0x34] sm:$0xf] %vm760_vm11, %v739_v51  ;;  %773 = vst.msk [vmem:[#allocation2 + $0x30] sm:$0xf] %vm760_vm11, %v737_v47 }
 0x147   : > { %v727_v43 = vpop.permute.xlu1 %726  ;;  %v725_v44 = vpop.permute.xlu0 %724 }
 0x148   : > { %768 = vst.msk [vmem:[#allocation2 + $0x1c] sm:$0xf] %vm760_vm11, %v727_v43  ;;  %767 = vst.msk [vmem:[#allocation2 + $0x18] sm:$0xf] %vm760_vm11, %v725_v44 }
 0x14b   : > { %v743_v3 = vpop.permute.xlu1 %742  ;;  %v741_v7 = vpop.permute.xlu0 %740 }
 0x14c   : > { %776 = vst.msk [vmem:[#allocation2 + $0x3c] sm:$0xf] %vm760_vm11, %v743_v3  ;;  %775 = vst.msk [vmem:[#allocation2 + $0x38] sm:$0xf] %vm760_vm11, %v741_v7 }
 0x14f   : > { %v788_v14 = vpop.permute.xlu1 %787  ;;  %v786_v15 = vpop.permute.xlu0 %785 }
 0x150   : > { %831 = vst.msk [vmem:[#allocation2 + $0x14] sm:$0xf] %vm825_vm12, %v788_v14  ;;  %830 = vst.msk [vmem:[#allocation2 + $0x10] sm:$0xf] %vm825_vm12, %v786_v15 }
 0x153   : > { %v804_v45 = vpop.permute.xlu1 %803  ;;  %v802_v50 = vpop.permute.xlu0 %801 }
 0x154   : > { %839 = vst.msk [vmem:[#allocation2 + $0x34] sm:$0xf] %vm825_vm12, %v804_v45  ;;  %838 = vst.msk [vmem:[#allocation2 + $0x30] sm:$0xf] %vm825_vm12, %v802_v50 }
 0x157   : > { %v792_v8 = vpop.permute.xlu1 %791  ;;  %v790_v53 = vpop.permute.xlu0 %789 }
 0x158   : > { %833 = vst.msk [vmem:[#allocation2 + $0x1c] sm:$0xf] %vm825_vm12, %v792_v8  ;;  %832 = vst.msk [vmem:[#allocation2 + $0x18] sm:$0xf] %vm825_vm12, %v790_v53 }
 0x15b   : > { %v808_v54 = vpop.permute.xlu1 %807  ;;  %v806_v55 = vpop.permute.xlu0 %805 }
 0x15c   : > { %841 = vst.msk [vmem:[#allocation2 + $0x3c] sm:$0xf] %vm825_vm12, %v808_v54  ;;  %840 = vst.msk [vmem:[#allocation2 + $0x38] sm:$0xf] %vm825_vm12, %v806_v55 }
 0x15f   : > { %v986_v9 = vpop.permute.xlu1 %985  ;;  %v984_v56 = vpop.permute.xlu0 %983 }
 0x160   : > { %1029 = vst.msk [vmem:[#allocation2 + $0x14] sm:$0xf] %vm1023_vm13, %v986_v9  ;;  %1028 = vst.msk [vmem:[#allocation2 + $0x10] sm:$0xf] %vm1023_vm13, %v984_v56 }
 0x163   : > { %v1002_v59 = vpop.permute.xlu1 %1001  ;;  %v1000_v52 = vpop.permute.xlu0 %999 }
 0x164   : > { %1037 = vst.msk [vmem:[#allocation2 + $0x34] sm:$0xf] %vm1023_vm13, %v1002_v59  ;;  %1036 = vst.msk [vmem:[#allocation2 + $0x30] sm:$0xf] %vm1023_vm13, %v1000_v52 }
 0x167   : > { %v990_v60 = vpop.permute.xlu1 %989  ;;  %v988_v10 = vpop.permute.xlu0 %987 }
 0x168   : > { %1031 = vst.msk [vmem:[#allocation2 + $0x1c] sm:$0xf] %vm1023_vm13, %v990_v60  ;;  %1030 = vst.msk [vmem:[#allocation2 + $0x18] sm:$0xf] %vm1023_vm13, %v988_v10 }
 0x16b   : > { %v1006_v11 = vpop.permute.xlu1 %1005  ;;  %v1004_v57 = vpop.permute.xlu0 %1003 }
 0x16c   : > { %1039 = vst.msk [vmem:[#allocation2 + $0x3c] sm:$0xf] %vm1023_vm13, %v1006_v11  ;;  %1038 = vst.msk [vmem:[#allocation2 + $0x38] sm:$0xf] %vm1023_vm13, %v1004_v57 }
 0x16f   : > { %v1051_v58 = vpop.permute.xlu1 %1050  ;;  %v1049_v61 = vpop.permute.xlu0 %1048 }
 0x170   : > { %1094 = vst.msk [vmem:[#allocation2 + $0x14] sm:$0xf] %vm1088_vm14, %v1051_v58  ;;  %1093 = vst.msk [vmem:[#allocation2 + $0x10] sm:$0xf] %vm1088_vm14, %v1049_v61 }
 0x173   : > { %v1067_v62 = vpop.permute.xlu1 %1066  ;;  %v1065_v63 = vpop.permute.xlu0 %1064 }
 0x174   : > { %1102 = vst.msk [vmem:[#allocation2 + $0x34] sm:$0xf] %vm1088_vm14, %v1067_v62  ;;  %1101 = vst.msk [vmem:[#allocation2 + $0x30] sm:$0xf] %vm1088_vm14, %v1065_v63 }
 0x177   : > { %v1055_v1 = vpop.permute.xlu1 %1054  ;;  %v1053_v12 = vpop.permute.xlu0 %1052 }
 0x178   : > { %1096 = vst.msk [vmem:[#allocation2 + $0x1c] sm:$0xf] %vm1088_vm14, %v1055_v1  ;;  %1095 = vst.msk [vmem:[#allocation2 + $0x18] sm:$0xf] %vm1088_vm14, %v1053_v12 }
 0x17b   : > { %v1071_v4 = vpop.permute.xlu1 %1070  ;;  %v1069_v5 = vpop.permute.xlu0 %1068 }
 0x17c   : > { %1104 = vst.msk [vmem:[#allocation2 + $0x3c] sm:$0xf] %vm1088_vm14, %v1071_v4  ;;  %1103 = vst.msk [vmem:[#allocation2 + $0x38] sm:$0xf] %vm1088_vm14, %v1069_v5 }
 0x17f   : > { %v1116_v13 = vpop.permute.xlu1 %1115  ;;  %v1114_v19 = vpop.permute.xlu0 %1113 }
 0x180   : > { %1159 = vst.msk [vmem:[#allocation2 + $0x14] sm:$0xf] %vm1153_vm15, %v1116_v13  ;;  %1158 = vst.msk [vmem:[#allocation2 + $0x10] sm:$0xf] %vm1153_vm15, %v1114_v19 }
 0x183   : > { %v1132_v20 = vpop.permute.xlu1 %1131  ;;  %v1130_v22 = vpop.permute.xlu0 %1129 }
 0x184   : > { %1167 = vst.msk [vmem:[#allocation2 + $0x34] sm:$0xf] %vm1153_vm15, %v1132_v20  ;;  %1166 = vst.msk [vmem:[#allocation2 + $0x30] sm:$0xf] %vm1153_vm15, %v1130_v22 }
 0x187   : > { %v1120_v33 = vpop.permute.xlu1 %1119  ;;  %v1118_v23 = vpop.permute.xlu0 %1117  ;;  %v1717_v24 = vld [vmem:[#allocation2 + $0x10] sm:$0xff]  }
 0x188   : > { %1161 = vst.msk [vmem:[#allocation2 + $0x1c] sm:$0xf] %vm1153_vm15, %v1120_v33  ;;  %1160 = vst.msk [vmem:[#allocation2 + $0x18] sm:$0xf] %vm1153_vm15, %v1118_v23  ;;  %1609 = vmatprep.mubr.msk.bf16.mxu0 %vm1246_vm0, %v1717_v24 }
 0x18b   : > { %v1136_v29 = vpop.permute.xlu1 %1135  ;;  %v1134_v25 = vpop.permute.xlu0 %1133  ;;  %v1718_v37 = vld [vmem:[#allocation2 + $0x30] sm:$0xff]  }
 0x18c   : > { %1169 = vst.msk [vmem:[#allocation2 + $0x3c] sm:$0xf] %vm1153_vm15, %v1136_v29  ;;  %1168 = vst.msk [vmem:[#allocation2 + $0x38] sm:$0xf] %vm1153_vm15, %v1134_v25  ;;  %1617 = vmatprep.mubr.msk.bf16.mxu1 %vm1246_vm0, %v1718_v37 }
 0x18f   : > { %v1719_v46 = vld [vmem:[#allocation2 + $0x18] sm:$0xff]  }
 0x190   : > { %1610 = vmatmul.mubr.msk.bf16.gmra.mxu0 %vm1246_vm0, %v1719_v46 }
 0x193   : > { %v1720_v26 = vld [vmem:[#allocation2 + $0x38] sm:$0xff]  }
 0x194   : > { %1618 = vmatmul.mubr.msk.bf16.gmra.mxu1 %vm1246_vm0, %v1720_v26 }
 0x1d8   : > { %v1607_v48 = vpop.f32.mrf.mxu0 }
 0x1d9   : > { %v1380_v28 = vmul.f32 %v1607_v48, %v2550_v27 }
 0x1da   : > { %v1309_v6 = vpop.f32.mrf.mxu0 }
 0x1db   : > { %v1400_v32 = vadd.f32 %v2555_v49, %v1380_v28  ;;  %v1378_v0 = vmul.f32 %v2550_v27, %v1309_v6 }
 0x1dc   : > { %v1615_v2 = vpop.f32.mrf.mxu1  ;;  %v1608_v34 = vpop.f32.mrf.mxu0 }
 0x1dd   : > { %v1388_v35 = vmul.f32 %v1615_v2, %v2550_v27  ;;  %v1416_v36 = vmax.f32 %v1400_v32, 0.0  ;;  %v1398_v17 = vadd.f32 %v2555_v49, %v1378_v0  ;;  %v1381_v18 = vmul.f32 %v1608_v34, %v2550_v27 }
 0x1de   : > { %v1341_v16 = vpop.f32.mrf.mxu1  ;;  %v1312_v38 = vpop.f32.mrf.mxu0 }
 0x1df   : > { %v1408_v30 = vadd.f32 %v2555_v49, %v1388_v35  ;;  %v1386_v21 = vmul.f32 %v2550_v27, %v1341_v16  ;;  %1432 = vst [vmem:[%s2567_s29 + $0x10] sm:$0xff] %v1416_v36  ;;  %v1414_v39 = vmax.f32 %v1398_v17, 0.0  ;;  %v1401_v31 = vadd.f32 %v2555_v49, %v1381_v18 }
 0x1e0   : > { %v1379_v40 = vmul.f32 %v2550_v27, %v1312_v38  ;;  %v1616_v42 = vpop.f32.mrf.mxu1 }
 0x1e1   : > { %v1424_v41 = vmax.f32 %v1408_v30, 0.0  ;;  %v1406_v51 = vadd.f32 %v2555_v49, %v1386_v21  ;;  %v1389_v47 = vmul.f32 %v1616_v42, %v2550_v27  ;;  %1430 = vst [vmem:[%s2567_s29] sm:$0xff] %v1414_v39  ;;  %v1417_v43 = vmax.f32 %v1401_v31, 0.0 }
 0x1e2   : > { %v1399_v44 = vadd.f32 %v2555_v49, %v1379_v40  ;;  %v1344_v3 = vpop.f32.mrf.mxu1 }
 0x1e3   : > { %1440 = vst [vmem:[%s2567_s29 + $0x50] sm:$0xff] %v1424_v41  ;;  %v1422_v7 = vmax.f32 %v1406_v51, 0.0  ;;  %v1409_v14 = vadd.f32 %v2555_v49, %v1389_v47  ;;  %v1387_v15 = vmul.f32 %v2550_v27, %v1344_v3  ;;  %1433 = vst [vmem:[%s2567_s29 + $0x18] sm:$0xff] %v1417_v43 }
 0x1e4   : > { %v1415_v45 = vmax.f32 %v1399_v44, 0.0 }
 0x1e5   : > { %1438 = vst [vmem:[%s2567_s29 + $0x40] sm:$0xff] %v1422_v7  ;;  %v1425_v50 = vmax.f32 %v1409_v14, 0.0  ;;  %v1407_v8 = vadd.f32 %v2555_v49, %v1387_v15 }
 0x1e6   : > { %1431 = vst [vmem:[%s2567_s29 + $0x8] sm:$0xff] %v1415_v45 }
 0x1e7   : > { %1441 = vst [vmem:[%s2567_s29 + $0x58] sm:$0xff] %v1425_v50  ;;  %v1423_v53 = vmax.f32 %v1407_v8, 0.0 }
 0x1e9   : > { %1439 = vst [vmem:[%s2567_s29 + $0x48] sm:$0xff] %v1423_v53 }
 0x250   : > { %v1611_v54 = vpop.f32.mrf.mxu0 }
 0x251   : > { %v1384_v55 = vmul.f32 %v1611_v54, %v2550_v27 }
 0x252   : > { %v1325_v9 = vpop.f32.mrf.mxu0 }
 0x253   : > { %v1404_v56 = vadd.f32 %v2555_v49, %v1384_v55  ;;  %v1382_v59 = vmul.f32 %v2550_v27, %v1325_v9 }
 0x254   : > { %v1612_v52 = vpop.f32.mrf.mxu0  ;;  %v1619_v60 = vpop.f32.mrf.mxu1 }
 0x255   : > { %v1420_v10 = vmax.f32 %v1404_v56, 0.0  ;;  %v1402_v11 = vadd.f32 %v2555_v49, %v1382_v59  ;;  %v1385_v57 = vmul.f32 %v1612_v52, %v2550_v27  ;;  %v1392_v58 = vmul.f32 %v1619_v60, %v2550_v27 }
 0x256   : > { %v1328_v61 = vpop.f32.mrf.mxu0  ;;  %v1357_v62 = vpop.f32.mrf.mxu1 }
 0x257   : > { %1436 = vst [vmem:[%s2567_s29 + $0x30] sm:$0xff] %v1420_v10  ;;  %v1418_v63 = vmax.f32 %v1402_v11, 0.0  ;;  %v1405_v1 = vadd.f32 %v2555_v49, %v1385_v57  ;;  %v1412_v12 = vadd.f32 %v2555_v49, %v1392_v58  ;;  %v1383_v4 = vmul.f32 %v2550_v27, %v1328_v61 }
 0x258   : > { %v1390_v5 = vmul.f32 %v2550_v27, %v1357_v62  ;;  %v1620_v13 = vpop.f32.mrf.mxu1 }
 0x259   : > { %1434 = vst [vmem:[%s2567_s29 + $0x20] sm:$0xff] %v1418_v63  ;;  %v1421_v19 = vmax.f32 %v1405_v1, 0.0  ;;  %v1428_v20 = vmax.f32 %v1412_v12, 0.0  ;;  %v1403_v22 = vadd.f32 %v2555_v49, %v1383_v4  ;;  %v1393_v33 = vmul.f32 %v1620_v13, %v2550_v27 }
 0x25a   : > { %v1410_v23 = vadd.f32 %v2555_v49, %v1390_v5  ;;  %v1360_v24 = vpop.f32.mrf.mxu1 }
 0x25b   : > { %1437 = vst [vmem:[%s2567_s29 + $0x38] sm:$0xff] %v1421_v19  ;;  %1444 = vst [vmem:[%s2567_s29 + $0x70] sm:$0xff] %v1428_v20  ;;  %v1419_v29 = vmax.f32 %v1403_v22, 0.0  ;;  %v1413_v25 = vadd.f32 %v2555_v49, %v1393_v33  ;;  %v1391_v37 = vmul.f32 %v2550_v27, %v1360_v24 }
 0x25c   : > { %v1426_v46 = vmax.f32 %v1410_v23, 0.0 }
 0x25d   : > { %1435 = vst [vmem:[%s2567_s29 + $0x28] sm:$0xff] %v1419_v29  ;;  %v1429_v26 = vmax.f32 %v1413_v25, 0.0  ;;  %v1411_v48 = vadd.f32 %v2555_v49, %v1391_v37 }
 0x25e   : > { %1442 = vst [vmem:[%s2567_s29 + $0x60] sm:$0xff] %v1426_v46 }
 0x25f   : > { %1445 = vst [vmem:[%s2567_s29 + $0x78] sm:$0xff] %v1429_v26  ;;  %v1427_v28 = vmax.f32 %v1411_v48, 0.0 }
 0x261   : > { %1443 = vst [vmem:[%s2567_s29 + $0x68] sm:$0xff] %v1427_v28 }
 0x262   : > { %1734 = shalt.err (!%p1731_p6)
}
 0x263   : > { %s1735_s10 = scalar_lea.hbm %s2613_s4, 2048  ;;  %s1739_s6 = scalar_lea.hbm %s2676_s3, 8192 }
 0x264   : > { %p1736_p7 = scmp.ne.s32.totalorder %s2613_s4, %s1735_s10  ;;  %p1740_p11 = scmp.lt.s32.totalorder %s2613_s4, %s2676_s3 }
 0x265   : > { %p1741_p12 = scmp.lt.s32.totalorder %s1739_s6, %s1735_s10 }
 0x266   : > { %p1737_p9 = pnand %p1736_p7, %p1896_p3 }
 0x267   : > { %p1742_p13 = por %p1741_p12, %p1740_p11 }
 0x268   : > { %p1738_p10 = pneg %p1737_p9 }
 0x26a   : > { %p1743_p0 = pnand %p1742_p13, %p1738_p10 }
 0x26c   : > { %1746 = shalt.err (!%p1743_p0)
}
 0x26d   : > { %s1824_s8 = smov 128  }
 0x26e   : > { %1630 = dma.vmem_to_hbm [thread:$0]  (%p1896_p3), %s2616_s16, 2048, %s2613_s4, %s2621_s11, %s1824_s8, %s1824_s8, %s1820_s28  }
 0x26f PF: > { %p1636_p1 = scmp.ge.s32.totalorder %s1813_s19, 2  ;;  %s1477_s9 = sand.u32 1, %s1785_s12  }
 0x270   : > { %s1478_s20 = scalar_lea.sflag [#allocation4], %s1477_s9 }
 0x271   : > { %p1633_p2 = pnand %p1636_p1, %p1905_p8 }
 0x273   : > { %p1634_p4 = pneg %p1633_p2 }
 0x275   : > { %1780 = dma.done.wait (%p1634_p4), %s1478_s20, 2048  }
 0x276   : > { %1782 = vsyncadd (%p1634_p4), %s1478_s20, 4294965248  ;;  %s16_s19 = sadd.s32 1, %s1813_s19   ;;  %s2683_s12 = smov %s1789_s13 }
 0x277   : > { %p13_p5 = scmp.ge.s32.totalorder %s16_s19, 6   ;;  %s2684_s13 = smov %s1793_s14 }
 0x278   : > { %s2685_s14 = smov %s1914_s30  ;;  %s2686_s15 = smov %s1805_s17 }
 0x279   : > { %s2687_s16 = smov %s1809_s18  ;;  %s2688_s17 = smov %s2691_s22 }
 0x27a   : > { %s2689_s18 = smov %s2695_s23  ;;  %15 = sbr.rel (!%p13_p5) target bundleno = 5 (0x5), region = 68 }
 0x27f   :  { %1483 = vsyncpa [#allocation4], 1 }
 0x280   :  { %1485 = vsyncpa [#allocation4 + $0x1], 1 }

</bundles_post_ra>
